<compile_context>
chip_gen: v7x
topology: tpu7x:2x2x1
jax: 0.10.0
libtpu: 0.0.40
codegen_flags: <defaults>
</compile_context>

<pallas_src>
import functools

import jax
import jax.numpy as jnp
from jax import lax
from jax.experimental import pallas as pl
from jax.experimental.pallas import tpu as pltpu

# ----------------------------- configuration --------------------------------
B = 1                       # batch (module's prompt handling assumes batch 1)
C_IN = 3
IMG = 16
PATCH = 8
GRID = IMG // PATCH
N_PATCH = GRID * GRID               # 4 patch tokens
PATCH_DIM = C_IN * PATCH * PATCH    # 192
D = 32                      # text_dim == CLIP joint embedding dim
WIDTH = 64                  # clip_model.visual.width (ViT width, prompt dim)
L_PROMPT = 2                # cfg.TRAINER.SPGFF.PROMPT_DEPTH_VISION
N_CTX = 2                   # cfg.TRAINER.SPGFF.N_CTX_VISION
N_PROMPT_ROWS = L_PROMPT * N_CTX
PROMPT_FLAT = N_PROMPT_ROWS * WIDTH     # 256
HIDDEN = 32                 # TextGuidedDeepPrompt hidden_dim
N_CLS = 5                   # number of classes
N_CLS_PAD = 128             # lane-dense padded class count for the logits store
NUM_HEADS = 8
HEAD_DIM = D // NUM_HEADS   # 4
# Both Attention and CrossAttention in the reference use head_dim ** -0.5 = 0.5
# (CrossAttention computes full-width scores but still scales by head_dim**-0.5).
SCALE = HEAD_DIM ** -0.5
ALPHA = 0.5                 # cfg.TRAINER.SPGFF.ALPHA
EPS = 1e-5                  # nn.LayerNorm eps
NORM_EPS = 1e-12            # eps inside the fused-feature L2-normalisation

assert HIDDEN == D          # lets w1a / w1b / b1 share the 32-column slabs
assert 3 * D <= PROMPT_FLAT  # wqkv fits in the 256-column "wide" slab

# --------------------- packed-slab row offsets (static) ----------------------
# mats slab [MATS_ROWS, 32]
MO_W_PE = 0
MO_W_PROJ = MO_W_PE + PATCH_DIM          # 192
MO_W_PP = MO_W_PROJ + D                  # 224
MO_W1A = MO_W_PP + PROMPT_FLAT           # 480
MO_W1B = MO_W1A + D                      # 512
MO_WPROJ_SA = MO_W1B + D                 # 544
MO_WQ_CA = MO_WPROJ_SA + D               # 576
MO_WPROJ_CA = MO_WQ_CA + D               # 608
MO_CLS = MO_WPROJ_CA + D                 # 640
MATS_ROWS = MO_CLS + N_CLS_PAD           # 768

# vecs slab [VECS_ROWS, 32]
(VO_B_PE, VO_B_PROJ, VO_B1, VO_N1W, VO_N1B, VO_N2QW, VO_N2QB,
 VO_N2KVW, VO_N2KVB, VO_BPROJ_SA, VO_BPROJ_CA, VO_FTXT) = range(12)
VECS_ROWS = VO_FTXT + N_CLS              # 16

# wide slab [WIDE_ROWS, 256]
WO_W2 = 0
WO_WQKV = WO_W2 + HIDDEN                 # 32
WO_B2 = WO_WQKV + D                      # 64
WIDE_ROWS = WO_B2 + 1                    # 65
WIDE_COLS = PROMPT_FLAT                  # 256

VMEM = functools.partial(pl.BlockSpec, memory_space=pltpu.MemorySpace.VMEM)


# ----------------------------- in-kernel helpers -----------------------------
def _softmax(x):
    m = jnp.max(x, axis=-1, keepdims=True)
    e = jnp.exp(x - m)
    # divide moved to the EUP slot (approx recip, ~1e-3 relative; acceptable)
    return e * pl.reciprocal(jnp.sum(e, axis=-1, keepdims=True), approx=True)


def _layernorm(x, w, b):
    mu = jnp.mean(x, axis=-1, keepdims=True)
    var = jnp.mean((x - mu) ** 2, axis=-1, keepdims=True)
    return (x - mu) * lax.rsqrt(var + EPS) * w + b


def _dot(a, bmat):
    return jnp.dot(a, bmat, preferred_element_type=jnp.float32)


def _dot_nt(a, bmat):
    # a [m, k] @ b[n, k]^T -> [m, n] without an explicit transpose.
    return lax.dot_general(a, bmat, (((1,), (1,)), ((), ())),
                           preferred_element_type=jnp.float32)


def _l2norm(x):
    return x * lax.rsqrt(jnp.sum(x * x, axis=-1, keepdims=True) + NORM_EPS)


# ----------------------------- fused Pallas kernel ---------------------------
def custom_clip_kernel(patches_ref, mats_ref, vecs_ref, wide_ref, out_ref):
    # --- static compile-time views into the 3 packed weight slabs -------------
    w_pe = mats_ref[MO_W_PE:MO_W_PE + PATCH_DIM, :]          # [192, 32]
    w_proj = mats_ref[MO_W_PROJ:MO_W_PROJ + D, :]            # [32, 32]
    w_pp = mats_ref[MO_W_PP:MO_W_PP + PROMPT_FLAT, :]        # [256, 32] pre-tiled/÷rows
    w1a = mats_ref[MO_W1A:MO_W1A + D, :]                     # [32, 32]
    w1b = mats_ref[MO_W1B:MO_W1B + D, :]                     # [32, 32]
    wproj_sa = mats_ref[MO_WPROJ_SA:MO_WPROJ_SA + D, :]      # [32, 32]
    wq_ca = mats_ref[MO_WQ_CA:MO_WQ_CA + D, :]               # [32, 32]
    wproj_ca = mats_ref[MO_WPROJ_CA:MO_WPROJ_CA + D, :]      # [32, 32]
    cls_txt = mats_ref[MO_CLS:MO_CLS + N_CLS_PAD, :]         # [128, 32] pre-norm*scale

    b_pe = vecs_ref[VO_B_PE:VO_B_PE + 1, :]
    b_proj = vecs_ref[VO_B_PROJ:VO_B_PROJ + 1, :]
    b1 = vecs_ref[VO_B1:VO_B1 + 1, :]
    n1w = vecs_ref[VO_N1W:VO_N1W + 1, :]
    n1b = vecs_ref[VO_N1B:VO_N1B + 1, :]
    n2qw = vecs_ref[VO_N2QW:VO_N2QW + 1, :]
    n2qb = vecs_ref[VO_N2QB:VO_N2QB + 1, :]
    n2kvw = vecs_ref[VO_N2KVW:VO_N2KVW + 1, :]
    n2kvb = vecs_ref[VO_N2KVB:VO_N2KVB + 1, :]
    bproj_sa = vecs_ref[VO_BPROJ_SA:VO_BPROJ_SA + 1, :]
    bproj_ca = vecs_ref[VO_BPROJ_CA:VO_BPROJ_CA + 1, :]
    ftxt = vecs_ref[VO_FTXT:VO_FTXT + N_CLS, :]               # [5, 32] fusion text

    w2 = wide_ref[WO_W2:WO_W2 + HIDDEN, :]                    # [32, 256]
    wqkv = wide_ref[WO_WQKV:WO_WQKV + D, :]                   # [32, 256]; cols>=96 zero
    b2 = wide_ref[WO_B2:WO_B2 + 1, :]                         # [1, 256]

    # ---- patch embedding: computed ONCE, reused by both encoder passes -------
    # TODO(synk): synthetic stand-in for the pretrained CLIP ViT image encoder
    # (linear patch embedding + prompt injection + mean pool + projection).
    tok_base = _dot(patches_ref[...], w_pe) + b_pe             # [N, D]

    # ---- pass 1: no prompts (prompt contribution is exactly zero) ------------
    pooled = jnp.mean(tok_base, axis=0, keepdims=True)         # [1, D]
    clip_feat = _dot(pooled, w_proj) + b_proj                  # [1, D]

    # ---- TextGuidedDeepPrompt.forward ----------------------------------------
    attn_w = _softmax(_dot_nt(clip_feat, ftxt))                # [1, n_cls]
    t_weighted = _dot(attn_w, ftxt)                            # [1, D]
    # MLP on concat([image_feat, T_weighted]) without an explicit concat:
    h = jnp.maximum(_dot(clip_feat, w1a) + _dot(t_weighted, w1b) + b1, 0.0)
    p_x = _dot(h, w2) + b2                                     # [1, L*n_ctx*W]
    # mean_r( prompts[r] @ w_pp ) == p_x @ (tile(w_pp, rows) / rows) — pre-folded
    prompt_vec = _dot(p_x, w_pp)                               # [1, D]

    # ---- pass 2: prompted encoder (pooled2 == pooled + prompt_vec exactly) ---
    prompt_feat = clip_feat + _dot(prompt_vec, w_proj)         # [1, D]
    tok = tok_base + prompt_vec                                # [N, D] bonder input

    # ---- bonder = CrossAttnBlock(prompt_patch_tokens, fusion_text) ------------
    # self-attention: query = query + SA(norm1(query)); one lane-dense QKV matmul
    x = _layernorm(tok, n1w, n1b)                              # [N, D]
    qkv = _dot(x, wqkv)                                        # [N, 256]; cols>=3D zero
    q = qkv[:, 0:D]
    k = qkv[:, D:2 * D]
    v = qkv[:, 2 * D:3 * D]
    head_outs = []
    for hh in range(NUM_HEADS):                                # static unroll, 8 heads
        lo, hi = hh * HEAD_DIM, (hh + 1) * HEAD_DIM
        ah = _softmax(_dot_nt(q[:, lo:hi], k[:, lo:hi]) * SCALE)   # [N, N]
        head_outs.append(_dot(ah, v[:, lo:hi]))                # [N, HEAD_DIM]
    o = jnp.concatenate(head_outs, axis=-1)                    # [N, D] head concat
    sa = _dot(o, wproj_sa) + bproj_sa                          # folded concat + proj
    query = tok + sa

    # cross-attention (single full-width head, matches CrossAttention):
    qn = _layernorm(query, n2qw, n2qb)
    kvn = _layernorm(ftxt, n2kvw, n2kvb)
    qc = _dot(qn, wq_ca)                                       # q Linear (no bias)
    ca = _dot(_softmax(_dot_nt(qc, kvn) * SCALE), kvn)         # attn @ v
    ca = _dot(ca, wproj_ca) + bproj_ca
    query = query + ca
    text_guide = jnp.mean(query, axis=0, keepdims=True)        # mean over tokens

    # ---- fusion + scaled cosine logits (lane-dense [1, 128] store) -----------
    fused = prompt_feat + ALPHA * text_guide                   # [1, D]
    # class text already L2-normalised and multiplied by exp(logit_scale) on host
    out_ref[...] = _dot_nt(_l2norm(fused), cls_txt)            # [1, N_CLS_PAD]


# ----------------------------- parameters ------------------------------------
def init_params(key):
    keys = iter(jax.random.split(key, 32))

    def rand(shape, scale=0.02):
        return (scale * jax.random.normal(next(keys), shape)).astype(jnp.float32)

    return dict(
        # synthetic image encoder (stand-in for CLIP ViT)
        w_pe=rand((PATCH_DIM, D)), b_pe=rand((1, D)),
        w_pp=rand((WIDTH, D)), w_proj=rand((D, D)), b_proj=rand((1, D)),
        # stand-ins for frozen CLIP text-encoder outputs
        gpt_text=rand((N_CLS, D), 1.0), hard_text=rand((N_CLS, D), 1.0),
        # TextGuidedDeepPrompt MLP: Linear(2D,H) -> ReLU -> Linear(H, L*n_ctx*width)
        w1=rand((2 * D, HIDDEN)), b1=rand((1, HIDDEN)),
        w2=rand((HIDDEN, PROMPT_FLAT)), b2=rand((1, PROMPT_FLAT)),
        # bonder = CrossAttnBlock(text_dim)
        n1w=jnp.ones((1, D), jnp.float32), n1b=jnp.zeros((1, D), jnp.float32),
        n2qw=jnp.ones((1, D), jnp.float32), n2qb=jnp.zeros((1, D), jnp.float32),
        n2kvw=jnp.ones((1, D), jnp.float32), n2kvb=jnp.zeros((1, D), jnp.float32),
        wqkv=rand((D, 3 * D)), wproj_sa=rand((D, D)), bproj_sa=rand((1, D)),
        wq=rand((D, D)), wproj_ca=rand((D, D)), bproj_ca=rand((1, D)),
        # CLIP logit_scale parameter (log(1/0.07))
        logit_scale=jnp.float32(jnp.log(1.0 / 0.07)),
    )


def pack_params(params, fusion_text='hard', class_text='hard'):
    """ONE-TIME host-side packing of the frozen weights into 3 slabs (4 DMAs
    total per forward incl. the image patches). Not in the per-forward path."""
    fusion_txt = params['hard_text'] if fusion_text == 'hard' else params['gpt_text']
    class_txt = params['hard_text'] if class_text == 'hard' else params['gpt_text']

    # prompt injection fold: mean_r(prompts[r] @ w_pp) == p_x @ (tile(w_pp)/rows)
    w_pp_eff = jnp.tile(params['w_pp'], (N_PROMPT_ROWS, 1)) / N_PROMPT_ROWS
    # MLP first layer split so concat([image_feat, T_weighted]) is never built
    w1a, w1b = params['w1'][:D, :], params['w1'][D:, :]
    # class text: L2-normalise once (frozen), fold exp(logit_scale), zero-pad to
    # 128 rows so the logits store is lane-dense.
    # TODO(synk): the usual CLIP clamp on exp(logit_scale) (<= 100) is omitted.
    cls_n = class_txt / jnp.sqrt(jnp.sum(class_txt * class_txt, -1, keepdims=True))
    cls_scaled = jnp.exp(params['logit_scale']) * cls_n
    cls_pad = jnp.zeros((N_CLS_PAD, D), jnp.float32).at[:N_CLS].set(cls_scaled)

    mats = jnp.concatenate(
        [params['w_pe'], params['w_proj'], w_pp_eff, w1a, w1b,
         params['wproj_sa'], params['wq'], params['wproj_ca'], cls_pad], axis=0)
    assert mats.shape == (MATS_ROWS, D)

    vecs = jnp.concatenate(
        [params['b_pe'], params['b_proj'], params['b1'],
         params['n1w'], params['n1b'], params['n2qw'], params['n2qb'],
         params['n2kvw'], params['n2kvb'],
         params['bproj_sa'], params['bproj_ca'], fusion_txt], axis=0)
    assert vecs.shape == (VECS_ROWS, D)

    wqkv_pad = jnp.zeros((D, WIDE_COLS), jnp.float32).at[:, :3 * D].set(params['wqkv'])
    wide = jnp.concatenate([params['w2'], wqkv_pad, params['b2']], axis=0)
    assert wide.shape == (WIDE_ROWS, WIDE_COLS)

    return dict(mats=jax.device_put(mats),
                vecs=jax.device_put(vecs),
                wide=jax.device_put(wide))


# ----------------------------- forward (CustomCLIP) ---------------------------
@jax.jit
def custom_clip_forward(image, mats, vecs, wide):
    # layout: image NCHW -> patches [N_PATCH, C*PATCH*PATCH], row-major (gy, gx)
    assert image.shape == (B, C_IN, IMG, IMG) and B == 1
    patches = image.reshape(B, C_IN, GRID, PATCH, GRID, PATCH)
    patches = patches.transpose(0, 2, 4, 1, 3, 5).reshape(N_PATCH, PATCH_DIM)
    patches = patches.astype(jnp.float32)

    logits_pad = pl.pallas_call(
        custom_clip_kernel,
        out_shape=jax.ShapeDtypeStruct((1, N_CLS_PAD), jnp.float32),
        in_specs=[VMEM(), VMEM(), VMEM(), VMEM()],
        out_specs=VMEM(),
    )(patches, mats, vecs, wide)

    # TODO(synk): training branch (cross-entropy + cosine KD loss) not implemented;
    # inference path (return logits) only.
    return logits_pad[:, :N_CLS]


# ----------------------------- main -------------------------------------------
if __name__ == "__main__":
    key = jax.random.PRNGKey(0)
    pkey, ikey = jax.random.split(key)
    params = init_params(pkey)
    packed = pack_params(params)          # one-time packing (frozen weights)
    image = jax.random.normal(ikey, (B, C_IN, IMG, IMG), dtype=jnp.float32)

    logits = custom_clip_forward(image, packed['mats'], packed['vecs'], packed['wide'])
    jax.block_until_ready(logits)
    assert logits.shape == (1, N_CLS)
    assert bool(jnp.all(jnp.isfinite(logits)))
    print("KERNEL_OK")
</pallas_src>

<mosaic_0001>
module attributes {stable_mosaic.version = 11 : i64} {
  func.func @custom_clip_kernel(%arg0: memref<4x192xf32, #tpu.memory_space<vmem>>, %arg1: memref<768x32xf32, #tpu.memory_space<vmem>>, %arg2: memref<16x32xf32, #tpu.memory_space<vmem>>, %arg3: memref<65x256xf32, #tpu.memory_space<vmem>>, %arg4: memref<1x128xf32, #tpu.memory_space<vmem>>) attributes {dimension_semantics = [], scalar_prefetch = 0 : i64, scratch_operands = 0 : i64, tpu.core_type = #tpu.core_type<tc>} {
    %c0 = arith.constant 0 : index
    %c0_0 = arith.constant 0 : index
    %0 = vector.load %arg1[%c0, %c0_0] : memref<768x32xf32, #tpu.memory_space<vmem>>, vector<192x32xf32>
    %c192 = arith.constant 192 : index
    %c0_1 = arith.constant 0 : index
    %1 = vector.load %arg1[%c192, %c0_1] : memref<768x32xf32, #tpu.memory_space<vmem>>, vector<32x32xf32>
    %c224 = arith.constant 224 : index
    %c0_2 = arith.constant 0 : index
    %2 = vector.load %arg1[%c224, %c0_2] : memref<768x32xf32, #tpu.memory_space<vmem>>, vector<256x32xf32>
    %c480 = arith.constant 480 : index
    %c0_3 = arith.constant 0 : index
    %3 = vector.load %arg1[%c480, %c0_3] : memref<768x32xf32, #tpu.memory_space<vmem>>, vector<32x32xf32>
    %c512 = arith.constant 512 : index
    %c0_4 = arith.constant 0 : index
    %4 = vector.load %arg1[%c512, %c0_4] : memref<768x32xf32, #tpu.memory_space<vmem>>, vector<32x32xf32>
    %c544 = arith.constant 544 : index
    %c0_5 = arith.constant 0 : index
    %5 = vector.load %arg1[%c544, %c0_5] : memref<768x32xf32, #tpu.memory_space<vmem>>, vector<32x32xf32>
    %c576 = arith.constant 576 : index
    %c0_6 = arith.constant 0 : index
    %6 = vector.load %arg1[%c576, %c0_6] : memref<768x32xf32, #tpu.memory_space<vmem>>, vector<32x32xf32>
    %c608 = arith.constant 608 : index
    %c0_7 = arith.constant 0 : index
    %7 = vector.load %arg1[%c608, %c0_7] : memref<768x32xf32, #tpu.memory_space<vmem>>, vector<32x32xf32>
    %c640 = arith.constant 640 : index
    %c0_8 = arith.constant 0 : index
    %8 = vector.load %arg1[%c640, %c0_8] : memref<768x32xf32, #tpu.memory_space<vmem>>, vector<128x32xf32>
    %c0_9 = arith.constant 0 : index
    %c0_10 = arith.constant 0 : index
    %9 = vector.load %arg2[%c0_9, %c0_10] : memref<16x32xf32, #tpu.memory_space<vmem>>, vector<1x32xf32>
    %c1 = arith.constant 1 : index
    %c0_11 = arith.constant 0 : index
    %10 = vector.load %arg2[%c1, %c0_11] : memref<16x32xf32, #tpu.memory_space<vmem>>, vector<1x32xf32>
    %c2 = arith.constant 2 : index
    %c0_12 = arith.constant 0 : index
    %11 = vector.load %arg2[%c2, %c0_12] : memref<16x32xf32, #tpu.memory_space<vmem>>, vector<1x32xf32>
    %c3 = arith.constant 3 : index
    %c0_13 = arith.constant 0 : index
    %12 = vector.load %arg2[%c3, %c0_13] : memref<16x32xf32, #tpu.memory_space<vmem>>, vector<1x32xf32>
    %c4 = arith.constant 4 : index
    %c0_14 = arith.constant 0 : index
    %13 = vector.load %arg2[%c4, %c0_14] : memref<16x32xf32, #tpu.memory_space<vmem>>, vector<1x32xf32>
    %c5 = arith.constant 5 : index
    %c0_15 = arith.constant 0 : index
    %14 = vector.load %arg2[%c5, %c0_15] : memref<16x32xf32, #tpu.memory_space<vmem>>, vector<1x32xf32>
    %c6 = arith.constant 6 : index
    %c0_16 = arith.constant 0 : index
    %15 = vector.load %arg2[%c6, %c0_16] : memref<16x32xf32, #tpu.memory_space<vmem>>, vector<1x32xf32>
    %c7 = arith.constant 7 : index
    %c0_17 = arith.constant 0 : index
    %16 = vector.load %arg2[%c7, %c0_17] : memref<16x32xf32, #tpu.memory_space<vmem>>, vector<1x32xf32>
    %c8 = arith.constant 8 : index
    %c0_18 = arith.constant 0 : index
    %17 = vector.load %arg2[%c8, %c0_18] : memref<16x32xf32, #tpu.memory_space<vmem>>, vector<1x32xf32>
    %c9 = arith.constant 9 : index
    %c0_19 = arith.constant 0 : index
    %18 = vector.load %arg2[%c9, %c0_19] : memref<16x32xf32, #tpu.memory_space<vmem>>, vector<1x32xf32>
    %c10 = arith.constant 10 : index
    %c0_20 = arith.constant 0 : index
    %19 = vector.load %arg2[%c10, %c0_20] : memref<16x32xf32, #tpu.memory_space<vmem>>, vector<1x32xf32>
    %c11 = arith.constant 11 : index
    %c0_21 = arith.constant 0 : index
    %20 = vector.load %arg2[%c11, %c0_21] : memref<16x32xf32, #tpu.memory_space<vmem>>, vector<5x32xf32>
    %c0_22 = arith.constant 0 : index
    %c0_23 = arith.constant 0 : index
    %21 = vector.load %arg3[%c0_22, %c0_23] : memref<65x256xf32, #tpu.memory_space<vmem>>, vector<32x256xf32>
    %c32 = arith.constant 32 : index
    %c0_24 = arith.constant 0 : index
    %22 = vector.load %arg3[%c32, %c0_24] : memref<65x256xf32, #tpu.memory_space<vmem>>, vector<32x256xf32>
    %c64 = arith.constant 64 : index
    %c0_25 = arith.constant 0 : index
    %23 = vector.load %arg3[%c64, %c0_25] : memref<65x256xf32, #tpu.memory_space<vmem>>, vector<1x256xf32>
    %c0_26 = arith.constant 0 : index
    %c0_27 = arith.constant 0 : index
    %24 = vector.load %arg0[%c0_26, %c0_27] : memref<4x192xf32, #tpu.memory_space<vmem>>, vector<4x192xf32>
    %cst = arith.constant dense<0.000000e+00> : vector<4x32xf32>
    %25 = tpu.matmul %24, %0, %cst {dimension_numbers = #tpu.dot_dimension_numbers<[1], [0], [0], [1], [0, 0, 1, 1], [], []>} : vector<4x192xf32>, vector<192x32xf32>, vector<4x32xf32> -> vector<4x32xf32>
    %26 = vector.broadcast %9 : vector<1x32xf32> to vector<4x32xf32>
    %27 = arith.addf %25, %26 : vector<4x32xf32>
    %cst_28 = arith.constant dense<0.000000e+00> : vector<32xf32>
    %28 = vector.multi_reduction <add>, %27, %cst_28 [0] : vector<4x32xf32> to vector<32xf32>
    %29 = vector.shape_cast %28 : vector<32xf32> to vector<1x32xf32>
    %cst_29 = arith.constant 4.000000e+00 : f32
    %30 = vector.broadcast %cst_29 : f32 to vector<1x32xf32>
    %31 = arith.divf %29, %30 : vector<1x32xf32>
    %cst_30 = arith.constant dense<0.000000e+00> : vector<1x32xf32>
    %32 = tpu.matmul %31, %1, %cst_30 {dimension_numbers = #tpu.dot_dimension_numbers<[1], [0], [0], [1], [0, 0, 1, 1], [], []>} : vector<1x32xf32>, vector<32x32xf32>, vector<1x32xf32> -> vector<1x32xf32>
    %33 = arith.addf %32, %10 : vector<1x32xf32>
    %cst_31 = arith.constant dense<0.000000e+00> : vector<1x5xf32>
    %34 = tpu.matmul %33, %20, %cst_31 {dimension_numbers = #tpu.dot_dimension_numbers<[1], [1], [0], [0], [0, 0, 1, 0], [], []>} : vector<1x32xf32>, vector<5x32xf32>, vector<1x5xf32> -> vector<1x5xf32>
    %cst_32 = arith.constant dense<0xFF800000> : vector<1xf32>
    %35 = vector.multi_reduction <maximumf>, %34, %cst_32 [1] : vector<1x5xf32> to vector<1xf32>
    %36 = vector.shape_cast %35 : vector<1xf32> to vector<1x1xf32>
    %37 = vector.broadcast %36 : vector<1x1xf32> to vector<1x5xf32>
    %38 = arith.subf %34, %37 : vector<1x5xf32>
    %39 = math.exp %38 : vector<1x5xf32>
    %cst_33 = arith.constant dense<0.000000e+00> : vector<1xf32>
    %40 = vector.multi_reduction <add>, %39, %cst_33 [1] : vector<1x5xf32> to vector<1xf32>
    %41 = vector.shape_cast %40 : vector<1xf32> to vector<1x1xf32>
    %42 = tpu.reciprocal %41 {approx = true} : vector<1x1xf32> -> vector<1x1xf32>
    %43 = vector.broadcast %42 : vector<1x1xf32> to vector<1x5xf32>
    %44 = arith.mulf %39, %43 : vector<1x5xf32>
    %cst_34 = arith.constant dense<0.000000e+00> : vector<1x32xf32>
    %45 = tpu.matmul %44, %20, %cst_34 {dimension_numbers = #tpu.dot_dimension_numbers<[1], [0], [0], [1], [0, 0, 1, 1], [], []>} : vector<1x5xf32>, vector<5x32xf32>, vector<1x32xf32> -> vector<1x32xf32>
    %cst_35 = arith.constant dense<0.000000e+00> : vector<1x32xf32>
    %46 = tpu.matmul %33, %3, %cst_35 {dimension_numbers = #tpu.dot_dimension_numbers<[1], [0], [0], [1], [0, 0, 1, 1], [], []>} : vector<1x32xf32>, vector<32x32xf32>, vector<1x32xf32> -> vector<1x32xf32>
    %cst_36 = arith.constant dense<0.000000e+00> : vector<1x32xf32>
    %47 = tpu.matmul %45, %4, %cst_36 {dimension_numbers = #tpu.dot_dimension_numbers<[1], [0], [0], [1], [0, 0, 1, 1], [], []>} : vector<1x32xf32>, vector<32x32xf32>, vector<1x32xf32> -> vector<1x32xf32>
    %48 = arith.addf %46, %47 : vector<1x32xf32>
    %49 = arith.addf %48, %11 : vector<1x32xf32>
    %cst_37 = arith.constant 0.000000e+00 : f32
    %50 = vector.broadcast %cst_37 : f32 to vector<1x32xf32>
    %51 = arith.maximumf %49, %50 : vector<1x32xf32>
    %cst_38 = arith.constant dense<0.000000e+00> : vector<1x256xf32>
    %52 = tpu.matmul %51, %21, %cst_38 {dimension_numbers = #tpu.dot_dimension_numbers<[1], [0], [0], [1], [0, 0, 1, 1], [], []>} : vector<1x32xf32>, vector<32x256xf32>, vector<1x256xf32> -> vector<1x256xf32>
    %53 = arith.addf %52, %23 : vector<1x256xf32>
    %cst_39 = arith.constant dense<0.000000e+00> : vector<1x32xf32>
    %54 = tpu.matmul %53, %2, %cst_39 {dimension_numbers = #tpu.dot_dimension_numbers<[1], [0], [0], [1], [0, 0, 1, 1], [], []>} : vector<1x256xf32>, vector<256x32xf32>, vector<1x32xf32> -> vector<1x32xf32>
    %cst_40 = arith.constant dense<0.000000e+00> : vector<1x32xf32>
    %55 = tpu.matmul %54, %1, %cst_40 {dimension_numbers = #tpu.dot_dimension_numbers<[1], [0], [0], [1], [0, 0, 1, 1], [], []>} : vector<1x32xf32>, vector<32x32xf32>, vector<1x32xf32> -> vector<1x32xf32>
    %56 = arith.addf %33, %55 : vector<1x32xf32>
    %57 = vector.broadcast %54 : vector<1x32xf32> to vector<4x32xf32>
    %58 = arith.addf %27, %57 : vector<4x32xf32>
    %cst_41 = arith.constant dense<0.000000e+00> : vector<4xf32>
    %59 = vector.multi_reduction <add>, %58, %cst_41 [1] : vector<4x32xf32> to vector<4xf32>
    %60 = vector.shape_cast %59 : vector<4xf32> to vector<4x1xf32>
    %cst_42 = arith.constant 3.200000e+01 : f32
    %61 = vector.broadcast %cst_42 : f32 to vector<4x1xf32>
    %62 = arith.divf %60, %61 : vector<4x1xf32>
    %63 = vector.broadcast %62 : vector<4x1xf32> to vector<4x32xf32>
    %64 = arith.subf %58, %63 : vector<4x32xf32>
    %65 = arith.mulf %64, %64 : vector<4x32xf32>
    %cst_43 = arith.constant dense<0.000000e+00> : vector<4xf32>
    %66 = vector.multi_reduction <add>, %65, %cst_43 [1] : vector<4x32xf32> to vector<4xf32>
    %67 = vector.shape_cast %66 : vector<4xf32> to vector<4x1xf32>
    %cst_44 = arith.constant 3.200000e+01 : f32
    %68 = vector.broadcast %cst_44 : f32 to vector<4x1xf32>
    %69 = arith.divf %67, %68 : vector<4x1xf32>
    %70 = vector.broadcast %62 : vector<4x1xf32> to vector<4x32xf32>
    %71 = arith.subf %58, %70 : vector<4x32xf32>
    %cst_45 = arith.constant 9.99999974E-6 : f32
    %72 = vector.broadcast %cst_45 : f32 to vector<4x1xf32>
    %73 = arith.addf %69, %72 : vector<4x1xf32>
    %74 = math.rsqrt %73 : vector<4x1xf32>
    %75 = vector.broadcast %74 : vector<4x1xf32> to vector<4x32xf32>
    %76 = arith.mulf %71, %75 : vector<4x32xf32>
    %77 = vector.broadcast %12 : vector<1x32xf32> to vector<4x32xf32>
    %78 = arith.mulf %76, %77 : vector<4x32xf32>
    %79 = vector.broadcast %13 : vector<1x32xf32> to vector<4x32xf32>
    %80 = arith.addf %78, %79 : vector<4x32xf32>
    %cst_46 = arith.constant dense<0.000000e+00> : vector<4x256xf32>
    %81 = tpu.matmul %80, %22, %cst_46 {dimension_numbers = #tpu.dot_dimension_numbers<[1], [0], [0], [1], [0, 0, 1, 1], [], []>} : vector<4x32xf32>, vector<32x256xf32>, vector<4x256xf32> -> vector<4x256xf32>
    %82 = vector.extract_strided_slice %81 {offsets = [0, 0], sizes = [4, 32], strides = [1, 1]} : vector<4x256xf32> to vector<4x32xf32>
    %83 = vector.extract_strided_slice %81 {offsets = [0, 32], sizes = [4, 32], strides = [1, 1]} : vector<4x256xf32> to vector<4x32xf32>
    %84 = vector.extract_strided_slice %81 {offsets = [0, 64], sizes = [4, 32], strides = [1, 1]} : vector<4x256xf32> to vector<4x32xf32>
    %85 = vector.extract_strided_slice %82 {offsets = [0, 0], sizes = [4, 4], strides = [1, 1]} : vector<4x32xf32> to vector<4x4xf32>
    %86 = vector.extract_strided_slice %83 {offsets = [0, 0], sizes = [4, 4], strides = [1, 1]} : vector<4x32xf32> to vector<4x4xf32>
    %cst_47 = arith.constant dense<0.000000e+00> : vector<4x4xf32>
    %87 = tpu.matmul %85, %86, %cst_47 {dimension_numbers = #tpu.dot_dimension_numbers<[1], [1], [0], [0], [0, 0, 1, 0], [], []>} : vector<4x4xf32>, vector<4x4xf32>, vector<4x4xf32> -> vector<4x4xf32>
    %cst_48 = arith.constant 5.000000e-01 : f32
    %88 = vector.broadcast %cst_48 : f32 to vector<4x4xf32>
    %89 = arith.mulf %87, %88 : vector<4x4xf32>
    %cst_49 = arith.constant dense<0xFF800000> : vector<4xf32>
    %90 = vector.multi_reduction <maximumf>, %89, %cst_49 [1] : vector<4x4xf32> to vector<4xf32>
    %91 = vector.shape_cast %90 : vector<4xf32> to vector<4x1xf32>
    %92 = vector.broadcast %91 : vector<4x1xf32> to vector<4x4xf32>
    %93 = arith.subf %89, %92 : vector<4x4xf32>
    %94 = math.exp %93 : vector<4x4xf32>
    %cst_50 = arith.constant dense<0.000000e+00> : vector<4xf32>
    %95 = vector.multi_reduction <add>, %94, %cst_50 [1] : vector<4x4xf32> to vector<4xf32>
    %96 = vector.shape_cast %95 : vector<4xf32> to vector<4x1xf32>
    %97 = tpu.reciprocal %96 {approx = true} : vector<4x1xf32> -> vector<4x1xf32>
    %98 = vector.broadcast %97 : vector<4x1xf32> to vector<4x4xf32>
    %99 = arith.mulf %94, %98 : vector<4x4xf32>
    %100 = vector.extract_strided_slice %84 {offsets = [0, 0], sizes = [4, 4], strides = [1, 1]} : vector<4x32xf32> to vector<4x4xf32>
    %cst_51 = arith.constant dense<0.000000e+00> : vector<4x4xf32>
    %101 = tpu.matmul %99, %100, %cst_51 {dimension_numbers = #tpu.dot_dimension_numbers<[1], [0], [0], [1], [0, 0, 1, 1], [], []>} : vector<4x4xf32>, vector<4x4xf32>, vector<4x4xf32> -> vector<4x4xf32>
    %102 = vector.extract_strided_slice %82 {offsets = [0, 4], sizes = [4, 4], strides = [1, 1]} : vector<4x32xf32> to vector<4x4xf32>
    %103 = vector.extract_strided_slice %83 {offsets = [0, 4], sizes = [4, 4], strides = [1, 1]} : vector<4x32xf32> to vector<4x4xf32>
    %cst_52 = arith.constant dense<0.000000e+00> : vector<4x4xf32>
    %104 = tpu.matmul %102, %103, %cst_52 {dimension_numbers = #tpu.dot_dimension_numbers<[1], [1], [0], [0], [0, 0, 1, 0], [], []>} : vector<4x4xf32>, vector<4x4xf32>, vector<4x4xf32> -> vector<4x4xf32>
    %cst_53 = arith.constant 5.000000e-01 : f32
    %105 = vector.broadcast %cst_53 : f32 to vector<4x4xf32>
    %106 = arith.mulf %104, %105 : vector<4x4xf32>
    %cst_54 = arith.constant dense<0xFF800000> : vector<4xf32>
    %107 = vector.multi_reduction <maximumf>, %106, %cst_54 [1] : vector<4x4xf32> to vector<4xf32>
    %108 = vector.shape_cast %107 : vector<4xf32> to vector<4x1xf32>
    %109 = vector.broadcast %108 : vector<4x1xf32> to vector<4x4xf32>
    %110 = arith.subf %106, %109 : vector<4x4xf32>
    %111 = math.exp %110 : vector<4x4xf32>
    %cst_55 = arith.constant dense<0.000000e+00> : vector<4xf32>
    %112 = vector.multi_reduction <add>, %111, %cst_55 [1] : vector<4x4xf32> to vector<4xf32>
    %113 = vector.shape_cast %112 : vector<4xf32> to vector<4x1xf32>
    %114 = tpu.reciprocal %113 {approx = true} : vector<4x1xf32> -> vector<4x1xf32>
    %115 = vector.broadcast %114 : vector<4x1xf32> to vector<4x4xf32>
    %116 = arith.mulf %111, %115 : vector<4x4xf32>
    %117 = vector.extract_strided_slice %84 {offsets = [0, 4], sizes = [4, 4], strides = [1, 1]} : vector<4x32xf32> to vector<4x4xf32>
    %cst_56 = arith.constant dense<0.000000e+00> : vector<4x4xf32>
    %118 = tpu.matmul %116, %117, %cst_56 {dimension_numbers = #tpu.dot_dimension_numbers<[1], [0], [0], [1], [0, 0, 1, 1], [], []>} : vector<4x4xf32>, vector<4x4xf32>, vector<4x4xf32> -> vector<4x4xf32>
    %119 = vector.extract_strided_slice %82 {offsets = [0, 8], sizes = [4, 4], strides = [1, 1]} : vector<4x32xf32> to vector<4x4xf32>
    %120 = vector.extract_strided_slice %83 {offsets = [0, 8], sizes = [4, 4], strides = [1, 1]} : vector<4x32xf32> to vector<4x4xf32>
    %cst_57 = arith.constant dense<0.000000e+00> : vector<4x4xf32>
    %121 = tpu.matmul %119, %120, %cst_57 {dimension_numbers = #tpu.dot_dimension_numbers<[1], [1], [0], [0], [0, 0, 1, 0], [], []>} : vector<4x4xf32>, vector<4x4xf32>, vector<4x4xf32> -> vector<4x4xf32>
    %cst_58 = arith.constant 5.000000e-01 : f32
    %122 = vector.broadcast %cst_58 : f32 to vector<4x4xf32>
    %123 = arith.mulf %121, %122 : vector<4x4xf32>
    %cst_59 = arith.constant dense<0xFF800000> : vector<4xf32>
    %124 = vector.multi_reduction <maximumf>, %123, %cst_59 [1] : vector<4x4xf32> to vector<4xf32>
    %125 = vector.shape_cast %124 : vector<4xf32> to vector<4x1xf32>
    %126 = vector.broadcast %125 : vector<4x1xf32> to vector<4x4xf32>
    %127 = arith.subf %123, %126 : vector<4x4xf32>
    %128 = math.exp %127 : vector<4x4xf32>
    %cst_60 = arith.constant dense<0.000000e+00> : vector<4xf32>
    %129 = vector.multi_reduction <add>, %128, %cst_60 [1] : vector<4x4xf32> to vector<4xf32>
    %130 = vector.shape_cast %129 : vector<4xf32> to vector<4x1xf32>
    %131 = tpu.reciprocal %130 {approx = true} : vector<4x1xf32> -> vector<4x1xf32>
    %132 = vector.broadcast %131 : vector<4x1xf32> to vector<4x4xf32>
    %133 = arith.mulf %128, %132 : vector<4x4xf32>
    %134 = vector.extract_strided_slice %84 {offsets = [0, 8], sizes = [4, 4], strides = [1, 1]} : vector<4x32xf32> to vector<4x4xf32>
    %cst_61 = arith.constant dense<0.000000e+00> : vector<4x4xf32>
    %135 = tpu.matmul %133, %134, %cst_61 {dimension_numbers = #tpu.dot_dimension_numbers<[1], [0], [0], [1], [0, 0, 1, 1], [], []>} : vector<4x4xf32>, vector<4x4xf32>, vector<4x4xf32> -> vector<4x4xf32>
    %136 = vector.extract_strided_slice %82 {offsets = [0, 12], sizes = [4, 4], strides = [1, 1]} : vector<4x32xf32> to vector<4x4xf32>
    %137 = vector.extract_strided_slice %83 {offsets = [0, 12], sizes = [4, 4], strides = [1, 1]} : vector<4x32xf32> to vector<4x4xf32>
    %cst_62 = arith.constant dense<0.000000e+00> : vector<4x4xf32>
    %138 = tpu.matmul %136, %137, %cst_62 {dimension_numbers = #tpu.dot_dimension_numbers<[1], [1], [0], [0], [0, 0, 1, 0], [], []>} : vector<4x4xf32>, vector<4x4xf32>, vector<4x4xf32> -> vector<4x4xf32>
    %cst_63 = arith.constant 5.000000e-01 : f32
    %139 = vector.broadcast %cst_63 : f32 to vector<4x4xf32>
    %140 = arith.mulf %138, %139 : vector<4x4xf32>
    %cst_64 = arith.constant dense<0xFF800000> : vector<4xf32>
    %141 = vector.multi_reduction <maximumf>, %140, %cst_64 [1] : vector<4x4xf32> to vector<4xf32>
    %142 = vector.shape_cast %141 : vector<4xf32> to vector<4x1xf32>
    %143 = vector.broadcast %142 : vector<4x1xf32> to vector<4x4xf32>
    %144 = arith.subf %140, %143 : vector<4x4xf32>
    %145 = math.exp %144 : vector<4x4xf32>
    %cst_65 = arith.constant dense<0.000000e+00> : vector<4xf32>
    %146 = vector.multi_reduction <add>, %145, %cst_65 [1] : vector<4x4xf32> to vector<4xf32>
    %147 = vector.shape_cast %146 : vector<4xf32> to vector<4x1xf32>
    %148 = tpu.reciprocal %147 {approx = true} : vector<4x1xf32> -> vector<4x1xf32>
    %149 = vector.broadcast %148 : vector<4x1xf32> to vector<4x4xf32>
    %150 = arith.mulf %145, %149 : vector<4x4xf32>
    %151 = vector.extract_strided_slice %84 {offsets = [0, 12], sizes = [4, 4], strides = [1, 1]} : vector<4x32xf32> to vector<4x4xf32>
    %cst_66 = arith.constant dense<0.000000e+00> : vector<4x4xf32>
    %152 = tpu.matmul %150, %151, %cst_66 {dimension_numbers = #tpu.dot_dimension_numbers<[1], [0], [0], [1], [0, 0, 1, 1], [], []>} : vector<4x4xf32>, vector<4x4xf32>, vector<4x4xf32> -> vector<4x4xf32>
    %153 = vector.extract_strided_slice %82 {offsets = [0, 16], sizes = [4, 4], strides = [1, 1]} : vector<4x32xf32> to vector<4x4xf32>
    %154 = vector.extract_strided_slice %83 {offsets = [0, 16], sizes = [4, 4], strides = [1, 1]} : vector<4x32xf32> to vector<4x4xf32>
    %cst_67 = arith.constant dense<0.000000e+00> : vector<4x4xf32>
    %155 = tpu.matmul %153, %154, %cst_67 {dimension_numbers = #tpu.dot_dimension_numbers<[1], [1], [0], [0], [0, 0, 1, 0], [], []>} : vector<4x4xf32>, vector<4x4xf32>, vector<4x4xf32> -> vector<4x4xf32>
    %cst_68 = arith.constant 5.000000e-01 : f32
    %156 = vector.broadcast %cst_68 : f32 to vector<4x4xf32>
    %157 = arith.mulf %155, %156 : vector<4x4xf32>
    %cst_69 = arith.constant dense<0xFF800000> : vector<4xf32>
    %158 = vector.multi_reduction <maximumf>, %157, %cst_69 [1] : vector<4x4xf32> to vector<4xf32>
    %159 = vector.shape_cast %158 : vector<4xf32> to vector<4x1xf32>
    %160 = vector.broadcast %159 : vector<4x1xf32> to vector<4x4xf32>
    %161 = arith.subf %157, %160 : vector<4x4xf32>
    %162 = math.exp %161 : vector<4x4xf32>
    %cst_70 = arith.constant dense<0.000000e+00> : vector<4xf32>
    %163 = vector.multi_reduction <add>, %162, %cst_70 [1] : vector<4x4xf32> to vector<4xf32>
    %164 = vector.shape_cast %163 : vector<4xf32> to vector<4x1xf32>
    %165 = tpu.reciprocal %164 {approx = true} : vector<4x1xf32> -> vector<4x1xf32>
    %166 = vector.broadcast %165 : vector<4x1xf32> to vector<4x4xf32>
    %167 = arith.mulf %162, %166 : vector<4x4xf32>
    %168 = vector.extract_strided_slice %84 {offsets = [0, 16], sizes = [4, 4], strides = [1, 1]} : vector<4x32xf32> to vector<4x4xf32>
    %cst_71 = arith.constant dense<0.000000e+00> : vector<4x4xf32>
    %169 = tpu.matmul %167, %168, %cst_71 {dimension_numbers = #tpu.dot_dimension_numbers<[1], [0], [0], [1], [0, 0, 1, 1], [], []>} : vector<4x4xf32>, vector<4x4xf32>, vector<4x4xf32> -> vector<4x4xf32>
    %170 = vector.extract_strided_slice %82 {offsets = [0, 20], sizes = [4, 4], strides = [1, 1]} : vector<4x32xf32> to vector<4x4xf32>
    %171 = vector.extract_strided_slice %83 {offsets = [0, 20], sizes = [4, 4], strides = [1, 1]} : vector<4x32xf32> to vector<4x4xf32>
    %cst_72 = arith.constant dense<0.000000e+00> : vector<4x4xf32>
    %172 = tpu.matmul %170, %171, %cst_72 {dimension_numbers = #tpu.dot_dimension_numbers<[1], [1], [0], [0], [0, 0, 1, 0], [], []>} : vector<4x4xf32>, vector<4x4xf32>, vector<4x4xf32> -> vector<4x4xf32>
    %cst_73 = arith.constant 5.000000e-01 : f32
    %173 = vector.broadcast %cst_73 : f32 to vector<4x4xf32>
    %174 = arith.mulf %172, %173 : vector<4x4xf32>
    %cst_74 = arith.constant dense<0xFF800000> : vector<4xf32>
    %175 = vector.multi_reduction <maximumf>, %174, %cst_74 [1] : vector<4x4xf32> to vector<4xf32>
    %176 = vector.shape_cast %175 : vector<4xf32> to vector<4x1xf32>
    %177 = vector.broadcast %176 : vector<4x1xf32> to vector<4x4xf32>
    %178 = arith.subf %174, %177 : vector<4x4xf32>
    %179 = math.exp %178 : vector<4x4xf32>
    %cst_75 = arith.constant dense<0.000000e+00> : vector<4xf32>
    %180 = vector.multi_reduction <add>, %179, %cst_75 [1] : vector<4x4xf32> to vector<4xf32>
    %181 = vector.shape_cast %180 : vector<4xf32> to vector<4x1xf32>
    %182 = tpu.reciprocal %181 {approx = true} : vector<4x1xf32> -> vector<4x1xf32>
    %183 = vector.broadcast %182 : vector<4x1xf32> to vector<4x4xf32>
    %184 = arith.mulf %179, %183 : vector<4x4xf32>
    %185 = vector.extract_strided_slice %84 {offsets = [0, 20], sizes = [4, 4], strides = [1, 1]} : vector<4x32xf32> to vector<4x4xf32>
    %cst_76 = arith.constant dense<0.000000e+00> : vector<4x4xf32>
    %186 = tpu.matmul %184, %185, %cst_76 {dimension_numbers = #tpu.dot_dimension_numbers<[1], [0], [0], [1], [0, 0, 1, 1], [], []>} : vector<4x4xf32>, vector<4x4xf32>, vector<4x4xf32> -> vector<4x4xf32>
    %187 = vector.extract_strided_slice %82 {offsets = [0, 24], sizes = [4, 4], strides = [1, 1]} : vector<4x32xf32> to vector<4x4xf32>
    %188 = vector.extract_strided_slice %83 {offsets = [0, 24], sizes = [4, 4], strides = [1, 1]} : vector<4x32xf32> to vector<4x4xf32>
    %cst_77 = arith.constant dense<0.000000e+00> : vector<4x4xf32>
    %189 = tpu.matmul %187, %188, %cst_77 {dimension_numbers = #tpu.dot_dimension_numbers<[1], [1], [0], [0], [0, 0, 1, 0], [], []>} : vector<4x4xf32>, vector<4x4xf32>, vector<4x4xf32> -> vector<4x4xf32>
    %cst_78 = arith.constant 5.000000e-01 : f32
    %190 = vector.broadcast %cst_78 : f32 to vector<4x4xf32>
    %191 = arith.mulf %189, %190 : vector<4x4xf32>
    %cst_79 = arith.constant dense<0xFF800000> : vector<4xf32>
    %192 = vector.multi_reduction <maximumf>, %191, %cst_79 [1] : vector<4x4xf32> to vector<4xf32>
    %193 = vector.shape_cast %192 : vector<4xf32> to vector<4x1xf32>
    %194 = vector.broadcast %193 : vector<4x1xf32> to vector<4x4xf32>
    %195 = arith.subf %191, %194 : vector<4x4xf32>
    %196 = math.exp %195 : vector<4x4xf32>
    %cst_80 = arith.constant dense<0.000000e+00> : vector<4xf32>
    %197 = vector.multi_reduction <add>, %196, %cst_80 [1] : vector<4x4xf32> to vector<4xf32>
    %198 = vector.shape_cast %197 : vector<4xf32> to vector<4x1xf32>
    %199 = tpu.reciprocal %198 {approx = true} : vector<4x1xf32> -> vector<4x1xf32>
    %200 = vector.broadcast %199 : vector<4x1xf32> to vector<4x4xf32>
    %201 = arith.mulf %196, %200 : vector<4x4xf32>
    %202 = vector.extract_strided_slice %84 {offsets = [0, 24], sizes = [4, 4], strides = [1, 1]} : vector<4x32xf32> to vector<4x4xf32>
    %cst_81 = arith.constant dense<0.000000e+00> : vector<4x4xf32>
    %203 = tpu.matmul %201, %202, %cst_81 {dimension_numbers = #tpu.dot_dimension_numbers<[1], [0], [0], [1], [0, 0, 1, 1], [], []>} : vector<4x4xf32>, vector<4x4xf32>, vector<4x4xf32> -> vector<4x4xf32>
    %204 = vector.extract_strided_slice %82 {offsets = [0, 28], sizes = [4, 4], strides = [1, 1]} : vector<4x32xf32> to vector<4x4xf32>
    %205 = vector.extract_strided_slice %83 {offsets = [0, 28], sizes = [4, 4], strides = [1, 1]} : vector<4x32xf32> to vector<4x4xf32>
    %cst_82 = arith.constant dense<0.000000e+00> : vector<4x4xf32>
    %206 = tpu.matmul %204, %205, %cst_82 {dimension_numbers = #tpu.dot_dimension_numbers<[1], [1], [0], [0], [0, 0, 1, 0], [], []>} : vector<4x4xf32>, vector<4x4xf32>, vector<4x4xf32> -> vector<4x4xf32>
    %cst_83 = arith.constant 5.000000e-01 : f32
    %207 = vector.broadcast %cst_83 : f32 to vector<4x4xf32>
    %208 = arith.mulf %206, %207 : vector<4x4xf32>
    %cst_84 = arith.constant dense<0xFF800000> : vector<4xf32>
    %209 = vector.multi_reduction <maximumf>, %208, %cst_84 [1] : vector<4x4xf32> to vector<4xf32>
    %210 = vector.shape_cast %209 : vector<4xf32> to vector<4x1xf32>
    %211 = vector.broadcast %210 : vector<4x1xf32> to vector<4x4xf32>
    %212 = arith.subf %208, %211 : vector<4x4xf32>
    %213 = math.exp %212 : vector<4x4xf32>
    %cst_85 = arith.constant dense<0.000000e+00> : vector<4xf32>
    %214 = vector.multi_reduction <add>, %213, %cst_85 [1] : vector<4x4xf32> to vector<4xf32>
    %215 = vector.shape_cast %214 : vector<4xf32> to vector<4x1xf32>
    %216 = tpu.reciprocal %215 {approx = true} : vector<4x1xf32> -> vector<4x1xf32>
    %217 = vector.broadcast %216 : vector<4x1xf32> to vector<4x4xf32>
    %218 = arith.mulf %213, %217 : vector<4x4xf32>
    %219 = vector.extract_strided_slice %84 {offsets = [0, 28], sizes = [4, 4], strides = [1, 1]} : vector<4x32xf32> to vector<4x4xf32>
    %cst_86 = arith.constant dense<0.000000e+00> : vector<4x4xf32>
    %220 = tpu.matmul %218, %219, %cst_86 {dimension_numbers = #tpu.dot_dimension_numbers<[1], [0], [0], [1], [0, 0, 1, 1], [], []>} : vector<4x4xf32>, vector<4x4xf32>, vector<4x4xf32> -> vector<4x4xf32>
    %221 = tpu.concatenate %101, %118, %135, %152, %169, %186, %203, %220 in 1 : vector<4x4xf32>, vector<4x4xf32>, vector<4x4xf32>, vector<4x4xf32>, vector<4x4xf32>, vector<4x4xf32>, vector<4x4xf32>, vector<4x4xf32> -> vector<4x32xf32>
    %cst_87 = arith.constant dense<0.000000e+00> : vector<4x32xf32>
    %222 = tpu.matmul %221, %5, %cst_87 {dimension_numbers = #tpu.dot_dimension_numbers<[1], [0], [0], [1], [0, 0, 1, 1], [], []>} : vector<4x32xf32>, vector<32x32xf32>, vector<4x32xf32> -> vector<4x32xf32>
    %223 = vector.broadcast %18 : vector<1x32xf32> to vector<4x32xf32>
    %224 = arith.addf %222, %223 : vector<4x32xf32>
    %225 = arith.addf %58, %224 : vector<4x32xf32>
    %cst_88 = arith.constant dense<0.000000e+00> : vector<4xf32>
    %226 = vector.multi_reduction <add>, %225, %cst_88 [1] : vector<4x32xf32> to vector<4xf32>
    %227 = vector.shape_cast %226 : vector<4xf32> to vector<4x1xf32>
    %cst_89 = arith.constant 3.200000e+01 : f32
    %228 = vector.broadcast %cst_89 : f32 to vector<4x1xf32>
    %229 = arith.divf %227, %228 : vector<4x1xf32>
    %230 = vector.broadcast %229 : vector<4x1xf32> to vector<4x32xf32>
    %231 = arith.subf %225, %230 : vector<4x32xf32>
    %232 = arith.mulf %231, %231 : vector<4x32xf32>
    %cst_90 = arith.constant dense<0.000000e+00> : vector<4xf32>
    %233 = vector.multi_reduction <add>, %232, %cst_90 [1] : vector<4x32xf32> to vector<4xf32>
    %234 = vector.shape_cast %233 : vector<4xf32> to vector<4x1xf32>
    %cst_91 = arith.constant 3.200000e+01 : f32
    %235 = vector.broadcast %cst_91 : f32 to vector<4x1xf32>
    %236 = arith.divf %234, %235 : vector<4x1xf32>
    %237 = vector.broadcast %229 : vector<4x1xf32> to vector<4x32xf32>
    %238 = arith.subf %225, %237 : vector<4x32xf32>
    %cst_92 = arith.constant 9.99999974E-6 : f32
    %239 = vector.broadcast %cst_92 : f32 to vector<4x1xf32>
    %240 = arith.addf %236, %239 : vector<4x1xf32>
    %241 = math.rsqrt %240 : vector<4x1xf32>
    %242 = vector.broadcast %241 : vector<4x1xf32> to vector<4x32xf32>
    %243 = arith.mulf %238, %242 : vector<4x32xf32>
    %244 = vector.broadcast %14 : vector<1x32xf32> to vector<4x32xf32>
    %245 = arith.mulf %243, %244 : vector<4x32xf32>
    %246 = vector.broadcast %15 : vector<1x32xf32> to vector<4x32xf32>
    %247 = arith.addf %245, %246 : vector<4x32xf32>
    %cst_93 = arith.constant dense<0.000000e+00> : vector<5xf32>
    %248 = vector.multi_reduction <add>, %20, %cst_93 [1] : vector<5x32xf32> to vector<5xf32>
    %249 = vector.shape_cast %248 : vector<5xf32> to vector<5x1xf32>
    %cst_94 = arith.constant 3.200000e+01 : f32
    %250 = vector.broadcast %cst_94 : f32 to vector<5x1xf32>
    %251 = arith.divf %249, %250 : vector<5x1xf32>
    %252 = vector.broadcast %251 : vector<5x1xf32> to vector<5x32xf32>
    %253 = arith.subf %20, %252 : vector<5x32xf32>
    %254 = arith.mulf %253, %253 : vector<5x32xf32>
    %cst_95 = arith.constant dense<0.000000e+00> : vector<5xf32>
    %255 = vector.multi_reduction <add>, %254, %cst_95 [1] : vector<5x32xf32> to vector<5xf32>
    %256 = vector.shape_cast %255 : vector<5xf32> to vector<5x1xf32>
    %cst_96 = arith.constant 3.200000e+01 : f32
    %257 = vector.broadcast %cst_96 : f32 to vector<5x1xf32>
    %258 = arith.divf %256, %257 : vector<5x1xf32>
    %259 = vector.broadcast %251 : vector<5x1xf32> to vector<5x32xf32>
    %260 = arith.subf %20, %259 : vector<5x32xf32>
    %cst_97 = arith.constant 9.99999974E-6 : f32
    %261 = vector.broadcast %cst_97 : f32 to vector<5x1xf32>
    %262 = arith.addf %258, %261 : vector<5x1xf32>
    %263 = math.rsqrt %262 : vector<5x1xf32>
    %264 = vector.broadcast %263 : vector<5x1xf32> to vector<5x32xf32>
    %265 = arith.mulf %260, %264 : vector<5x32xf32>
    %266 = vector.broadcast %16 : vector<1x32xf32> to vector<5x32xf32>
    %267 = arith.mulf %265, %266 : vector<5x32xf32>
    %268 = vector.broadcast %17 : vector<1x32xf32> to vector<5x32xf32>
    %269 = arith.addf %267, %268 : vector<5x32xf32>
    %cst_98 = arith.constant dense<0.000000e+00> : vector<4x32xf32>
    %270 = tpu.matmul %247, %6, %cst_98 {dimension_numbers = #tpu.dot_dimension_numbers<[1], [0], [0], [1], [0, 0, 1, 1], [], []>} : vector<4x32xf32>, vector<32x32xf32>, vector<4x32xf32> -> vector<4x32xf32>
    %cst_99 = arith.constant dense<0.000000e+00> : vector<4x5xf32>
    %271 = tpu.matmul %270, %269, %cst_99 {dimension_numbers = #tpu.dot_dimension_numbers<[1], [1], [0], [0], [0, 0, 1, 0], [], []>} : vector<4x32xf32>, vector<5x32xf32>, vector<4x5xf32> -> vector<4x5xf32>
    %cst_100 = arith.constant 5.000000e-01 : f32
    %272 = vector.broadcast %cst_100 : f32 to vector<4x5xf32>
    %273 = arith.mulf %271, %272 : vector<4x5xf32>
    %cst_101 = arith.constant dense<0xFF800000> : vector<4xf32>
    %274 = vector.multi_reduction <maximumf>, %273, %cst_101 [1] : vector<4x5xf32> to vector<4xf32>
    %275 = vector.shape_cast %274 : vector<4xf32> to vector<4x1xf32>
    %276 = vector.broadcast %275 : vector<4x1xf32> to vector<4x5xf32>
    %277 = arith.subf %273, %276 : vector<4x5xf32>
    %278 = math.exp %277 : vector<4x5xf32>
    %cst_102 = arith.constant dense<0.000000e+00> : vector<4xf32>
    %279 = vector.multi_reduction <add>, %278, %cst_102 [1] : vector<4x5xf32> to vector<4xf32>
    %280 = vector.shape_cast %279 : vector<4xf32> to vector<4x1xf32>
    %281 = tpu.reciprocal %280 {approx = true} : vector<4x1xf32> -> vector<4x1xf32>
    %282 = vector.broadcast %281 : vector<4x1xf32> to vector<4x5xf32>
    %283 = arith.mulf %278, %282 : vector<4x5xf32>
    %cst_103 = arith.constant dense<0.000000e+00> : vector<4x32xf32>
    %284 = tpu.matmul %283, %269, %cst_103 {dimension_numbers = #tpu.dot_dimension_numbers<[1], [0], [0], [1], [0, 0, 1, 1], [], []>} : vector<4x5xf32>, vector<5x32xf32>, vector<4x32xf32> -> vector<4x32xf32>
    %cst_104 = arith.constant dense<0.000000e+00> : vector<4x32xf32>
    %285 = tpu.matmul %284, %7, %cst_104 {dimension_numbers = #tpu.dot_dimension_numbers<[1], [0], [0], [1], [0, 0, 1, 1], [], []>} : vector<4x32xf32>, vector<32x32xf32>, vector<4x32xf32> -> vector<4x32xf32>
    %286 = vector.broadcast %19 : vector<1x32xf32> to vector<4x32xf32>
    %287 = arith.addf %285, %286 : vector<4x32xf32>
    %288 = arith.addf %225, %287 : vector<4x32xf32>
    %cst_105 = arith.constant dense<0.000000e+00> : vector<32xf32>
    %289 = vector.multi_reduction <add>, %288, %cst_105 [0] : vector<4x32xf32> to vector<32xf32>
    %290 = vector.shape_cast %289 : vector<32xf32> to vector<1x32xf32>
    %cst_106 = arith.constant 4.000000e+00 : f32
    %291 = vector.broadcast %cst_106 : f32 to vector<1x32xf32>
    %292 = arith.divf %290, %291 : vector<1x32xf32>
    %cst_107 = arith.constant 5.000000e-01 : f32
    %293 = vector.broadcast %cst_107 : f32 to vector<1x32xf32>
    %294 = arith.mulf %293, %292 : vector<1x32xf32>
    %295 = arith.addf %56, %294 : vector<1x32xf32>
    %296 = arith.mulf %295, %295 : vector<1x32xf32>
    %cst_108 = arith.constant dense<0.000000e+00> : vector<1xf32>
    %297 = vector.multi_reduction <add>, %296, %cst_108 [1] : vector<1x32xf32> to vector<1xf32>
    %298 = vector.shape_cast %297 : vector<1xf32> to vector<1x1xf32>
    %cst_109 = arith.constant 9.99999996E-13 : f32
    %299 = vector.broadcast %cst_109 : f32 to vector<1x1xf32>
    %300 = arith.addf %298, %299 : vector<1x1xf32>
    %301 = math.rsqrt %300 : vector<1x1xf32>
    %302 = vector.broadcast %301 : vector<1x1xf32> to vector<1x32xf32>
    %303 = arith.mulf %295, %302 : vector<1x32xf32>
    %cst_110 = arith.constant dense<0.000000e+00> : vector<1x128xf32>
    %304 = tpu.matmul %303, %8, %cst_110 {dimension_numbers = #tpu.dot_dimension_numbers<[1], [1], [0], [0], [0, 0, 1, 0], [], []>} : vector<1x32xf32>, vector<128x32xf32>, vector<1x128xf32> -> vector<1x128xf32>
    %c0_111 = arith.constant 0 : index
    %c0_112 = arith.constant 0 : index
    %305 = vector.load %arg4[%c0_111, %c0_112] : memref<1x128xf32, #tpu.memory_space<vmem>>, vector<1x128xf32>
    tpu.vector_store %arg4[%c0_111, %c0_112], %304 {strides = array<i32>} : memref<1x128xf32, #tpu.memory_space<vmem>>, vector<1x128xf32>,
    return
  }
}

</mosaic_0001>

<bundles_post_ra>
// kernel: custom_clip_forward.1
= control target key start
LH: loop header
LB: loop body
LE: loop exit
PB: predicated region body
PF: predicated region fallthrough
CT: control target
= control target key end

     0   :  { %v3604_v3 = vmov 0.0|0.0   ;;  %vm151_vm0 = vcmask 523264   ;;  %s4332_s0 = inlined_call_operand.vmem [shape: f32[4,192], index: 0, kind: input, shape index: {}]   ;;  %s4333_s1 = inlined_call_operand.vmem [shape: f32[768,32], index: 1, kind: input, shape index: {}]   ;;  %s4334_s2 = inlined_call_operand.vmem [shape: f32[16,32], index: 2, kind: input, shape index: {}]   ;;  %s4335_s3 = inlined_call_operand.vmem [shape: f32[65,256], index: 3, kind: input, shape index: {}]   ;;  %s4336_s4 = inlined_call_operand.hbm [shape: f32[1,128], index: 4, kind: output, shape index: {}]  }
   0x1   :  { %v18_v0 = vld [vmem:[%s4333_s1] sm:$0xff]  ;;  %v19_v1 = vld [vmem:[%s4333_s1 + $0x8] sm:$0xff]  ;;  %v20_v2 = vld [vmem:[%s4333_s1 + $0x10] sm:$0xff]  ;;  %3338 = vmatprep.subr.bf16.mxu0 %v3604_v3  ;;  %3374 = vmatprep.subr.bf16.mxu1 %v3604_v3 }
   0x2   :  { %v3339_v4 = vpack.c.bf16 %v19_v1, %v18_v0  ;;  %v21_v5 = vld [vmem:[%s4333_s1 + $0x18] sm:$0xff]  ;;  %v22_v7 = vld [vmem:[%s4333_s1 + $0x20] sm:$0xff]  ;;  %v23_v8 = vld [vmem:[%s4333_s1 + $0x28] sm:$0xff] }
   0x3   :  { %v3342_v6 = vpack.c.bf16 %v21_v5, %v20_v2  ;;  %v3345_v9 = vpack.c.bf16 %v23_v8, %v22_v7  ;;  %v24_v10 = vld [vmem:[%s4333_s1 + $0x30] sm:$0xff]  ;;  %v25_v11 = vld [vmem:[%s4333_s1 + $0x38] sm:$0xff]  ;;  %v144_v12 = vld [vmem:[%s4332_s0] sm:$0xff] }
   0x4   :  { %3340 = vmatpush1.bf16.msra.mxu0 %v3339_v4 }
   0x5   :  { %3341 = vmatprep.subr.bf16.mxu0 %v3604_v3 }
   0x8   :  { %3343 = vmatpush1.bf16.msra.mxu0 %v3342_v6 }
   0x9   :  { %3344 = vmatprep.subr.bf16.mxu0 %v3604_v3 }
   0xa   :  { %9 = vsyncpa [#allocation3], 0  ;;  %v150_v13 = vcombine.high %v144_v12, %v144_v12  ;;  %v3348_v14 = vpack.c.bf16 %v25_v11, %v24_v10  ;;  %v26_v15 = vld [vmem:[%s4333_s1 + $0x40] sm:$0xff]  ;;  %v27_v16 = vld [vmem:[%s4333_s1 + $0x48] sm:$0xff]  ;;  %vm3605_vm1 = vmmov 0   ;;  %v3606_v45 = vmov 0.0  }
   0xb   :  { %v3351_v17 = vpack.c.bf16 %v27_v16, %v26_v15  ;;  %v28_v18 = vld [vmem:[%s4333_s1 + $0x50] sm:$0xff]  ;;  %v29_v19 = vld [vmem:[%s4333_s1 + $0x58] sm:$0xff]  ;;  %v30_v21 = vld [vmem:[%s4333_s1 + $0x60] sm:$0xff]  ;;  %3134 = vmatprep.mubr.msk.f32.mxu1 %vm3605_vm1, %v3606_v45  ;;  %vm224_vm2 = vcmask 257024   ;;  %vm234_vm3 = vcmask 261120   ;;  %vm384_vm4 = vcmask 32768  }
   0xc   :  { %3346 = vmatpush1.bf16.msra.mxu0 %v3345_v9  ;;  %2924 = vmatprep.mubr.msk.f32.mxu0 %vm151_vm0, %v150_v13  ;;  %v3354_v20 = vpack.c.bf16 %v29_v19, %v28_v18  ;;  %v31_v22 = vld [vmem:[%s4333_s1 + $0x68] sm:$0xff]  ;;  %v32_v24 = vld [vmem:[%s4333_s1 + $0x70] sm:$0xff]  ;;  %v33_v25 = vld [vmem:[%s4333_s1 + $0x78] sm:$0xff]  ;;  %vm400_vm5 = vcmask 1044480   ;;  %vm396_vm6 = vcmask 39936   ;;  %s3607_s10 = smov 96  }
   0xd   :  { %3347 = vmatprep.subr.bf16.mxu0 %v3604_v3  ;;  %v3357_v23 = vpack.c.bf16 %v31_v22, %v30_v21  ;;  %v3360_v26 = vpack.c.bf16 %v33_v25, %v32_v24  ;;  %v34_v27 = vld [vmem:[%s4333_s1 + $0x80] sm:$0xff]  ;;  %v35_v28 = vld [vmem:[%s4333_s1 + $0x88] sm:$0xff]  ;;  %v36_v30 = vld [vmem:[%s4333_s1 + $0x90] sm:$0xff]  ;;  %s3608_s0 = smov 92   ;;  %s3609_s11 = smov 88   ;;  %vm952_vm7 = vcmask 31744  }
   0xe   :  { %v3363_v29 = vpack.c.bf16 %v35_v28, %v34_v27  ;;  %v37_v31 = vld [vmem:[%s4333_s1 + $0x98] sm:$0xff]  ;;  %v38_v33 = vld [vmem:[%s4333_s1 + $0xa0] sm:$0xff]  ;;  %v39_v34 = vld [vmem:[%s4333_s1 + $0xa8] sm:$0xff]  ;;  %s3610_s12 = smov 84   ;;  %s3611_s13 = smov 80   ;;  %vm1028_vm8 = vcmask 27648  }
   0xf   :  { %v3366_v32 = vpack.c.bf16 %v37_v31, %v36_v30  ;;  %v3369_v35 = vpack.c.bf16 %v39_v34, %v38_v33  ;;  %v40_v36 = vld [vmem:[%s4333_s1 + $0xb0] sm:$0xff]  ;;  %v41_v37 = vld [vmem:[%s4333_s1 + $0xb8] sm:$0xff]  ;;  %v42_v39 = vld [vmem:[%s4333_s1 + $0xc0] sm:$0xff]  ;;  %s3612_s14 = smov 76   ;;  %s3613_s15 = smov 72   ;;  %vm1045_vm9 = vcmask 1043456  }
  0x10   :  { %3349 = vmatpush1.bf16.msra.mxu0 %v3348_v14  ;;  %v3372_v38 = vpack.c.bf16 %v41_v37, %v40_v36  ;;  %v43_v40 = vld [vmem:[%s4333_s1 + $0xc8] sm:$0xff]  ;;  %v44_v42 = vld [vmem:[%s4333_s1 + $0xd0] sm:$0xff]  ;;  %v45_v43 = vld [vmem:[%s4333_s1 + $0xd8] sm:$0xff]  ;;  %s3614_s16 = smov 68   ;;  %s3615_s17 = smov 64   ;;  %vm2316_vm10 = vcmask 64512  }
  0x11   :  { %3350 = vmatprep.subr.bf16.mxu0 %v3604_v3  ;;  %v3757_v41 = vpack.c.bf16 %v43_v40, %v42_v39  ;;  %v3767_v44 = vpack.c.bf16 %v45_v43, %v44_v42  ;;  %v2923_v46 = vld [vmem:[%s4334_s2] ss:$0 sm:$0xff]  ;;  %v125_v58 = vld [vmem:[%s4334_s2 + $0xb] sm:$0x1f]  ;;  %v115_v59 = vld [vmem:[%s4334_s2 + $0x1] sm:$0x1] }
  0x12   :  { %v82_v9 = vld [vmem:[%s4333_s1 + $0x200] sm:$0xff]  ;;  %v83_v10 = vld [vmem:[%s4333_s1 + $0x208] sm:$0xff]  ;;  %v84_v14 = vld [vmem:[%s4333_s1 + $0x210] sm:$0xff]  ;;  %s3616_s18 = smov 124   ;;  %s3617_s19 = smov 120   ;;  %vm2318_vm11 = vcmask 97280  }
  0x13   :  { %3376 = vmatpush3.bf16.msra.mxu1 %v3757_v41  ;;  %v85_v15 = vld [vmem:[%s4333_s1 + $0x218] sm:$0xff]  ;;  %v79_v18 = vld [vmem:[%s4333_s1 + $0x1e8] sm:$0xff]  ;;  %v126_v28 = vld [vmem:[%s4335_s3] sm:$0xff]  ;;  %s3618_s20 = smov 116   ;;  %s3619_s21 = smov 112   ;;  %vm2320_vm12 = vcmask 130048  }
  0x14   :  { %3352 = vmatpush1.bf16.msra.mxu0 %v3351_v17  ;;  %3377 = vmatprep.subr.bf16.mxu1 %v3604_v3  ;;  %v3384_v16 = vpack.c.bf16 %v85_v15, %v84_v14  ;;  %v78_v17 = vld [vmem:[%s4333_s1 + $0x1e0] sm:$0xff]  ;;  %v81_v21 = vld [vmem:[%s4333_s1 + $0x1f8] sm:$0xff]  ;;  %v127_v25 = vld [vmem:[%s4335_s3 + $0x8] sm:$0xff]  ;;  %s3620_s22 = smov 108   ;;  %s3621_s23 = smov 104   ;;  %vm2322_vm13 = vcmask 162816  }
  0x15   :  { %3353 = vmatprep.subr.bf16.mxu0 %v3604_v3  ;;  %v3387_v19 = vpack.c.bf16 %v79_v18, %v78_v17  ;;  %v131_v31 = vld [vmem:[%s4335_s3 + $0x28] sm:$0xff]  ;;  %v130_v34 = vld [vmem:[%s4335_s3 + $0x20] sm:$0xff]  ;;  %v64_v43 = vld [vmem:[%s4333_s1 + $0x170] sm:$0xff]  ;;  %s3622_s24 = smov 100   ;;  %s3623_s25 = smov 56   ;;  %vm2324_vm14 = vcmask 195584  }
  0x16   :  { %v62_v37 = vld [vmem:[%s4333_s1 + $0x160] sm:$0xff]  ;;  %v47_v42 = vld [vmem:[%s4333_s1 + $0xe8] sm:$0xff]  ;;  %s3624_s26 = smov 52   ;;  %s3625_s27 = smov 48   ;;  %vm2326_vm15 = vcmask 228352   ;;  %vm2429_vm0 = vcmask 258048  }
  0x17   :  { %3379 = vmatpush3.bf16.msra.mxu1 %v3767_v44  ;;  %v46_v39 = vld [vmem:[%s4333_s1 + $0xe0] sm:$0xff]  ;;  %v75_v15 = vld [vmem:[%s4333_s1 + $0x1c8] sm:$0xff]  ;;  %s3626_s28 = smov 60   ;;  %s3627_s29 = smov 44  }
  0x18   :  { %3355 = vmatpush1.bf16.msra.mxu0 %v3354_v20  ;;  %3137 = vmatprep.subr.mxu1 %v3606_v45  ;;  %v80_v20 = vld [vmem:[%s4333_s1 + $0x1f0] sm:$0xff]  ;;  %v74_v14 = vld [vmem:[%s4333_s1 + $0x1c0] sm:$0xff]  ;;  %s3628_s30 = smov 40   ;;  %s3629_s5 = smov 36  }
  0x19   :  { %3356 = vmatprep.subr.bf16.mxu0 %v3604_v3  ;;  %v3390_v24 = vpack.c.bf16 %v81_v21, %v80_v20  ;;  %v3424_v17 = vpack.c.bf16 %v75_v15, %v74_v14  ;;  %v58_v18 = vld [vmem:[%s4333_s1 + $0x140] sm:$0xff]  ;;  %s3630_s6 = smov 4  }
  0x1a   :  { %v2934_v14 = vld [vmem:[%s4334_s2 + $0x3] ss:$0 sm:$0xff] }
  0x1c   :  { %3358 = vmatpush1.bf16.msra.mxu0 %v3357_v23 }
  0x1d   :  { %3359 = vmatprep.subr.bf16.mxu0 %v3604_v3 }
  0x20   :  { %3361 = vmatpush1.bf16.msra.mxu0 %v3360_v26  ;;  %v129_v26 = vld [vmem:[%s4335_s3 + $0x18] sm:$0xff] }
  0x21   :  { %3362 = vmatprep.subr.bf16.mxu0 %v3604_v3  ;;  %v3392_v27 = vpack.c.bf16 %v129_v26, %v127_v25 }
  0x24   :  { %3364 = vmatpush1.bf16.msra.mxu0 %v3363_v29  ;;  %v128_v29 = vld [vmem:[%s4335_s3 + $0x10] sm:$0xff] }
  0x25   :  { %3365 = vmatprep.subr.bf16.mxu0 %v3604_v3  ;;  %v3394_v30 = vpack.c.bf16 %v128_v29, %v126_v28  ;;  %v76_v29 = vld [vmem:[%s4333_s1 + $0x1d0] sm:$0xff] }
  0x28   :  { %3367 = vmatpush1.bf16.msra.mxu0 %v3366_v32  ;;  %v133_v32 = vld [vmem:[%s4335_s3 + $0x38] sm:$0xff] }
  0x29   :  { %3368 = vmatprep.subr.bf16.mxu0 %v3604_v3  ;;  %v3396_v33 = vpack.c.bf16 %v133_v32, %v131_v31  ;;  %v60_v32 = vld [vmem:[%s4333_s1 + $0x150] sm:$0xff] }
  0x2c   :  { %3370 = vmatpush1.bf16.msra.mxu0 %v3369_v35  ;;  %v132_v35 = vld [vmem:[%s4335_s3 + $0x30] sm:$0xff] }
  0x2d   :  { %3371 = vmatprep.subr.bf16.mxu0 %v3604_v3  ;;  %v3398_v36 = vpack.c.bf16 %v132_v35, %v130_v34  ;;  %v619_v35 = vlaneseq }
  0x30   :  { %3373 = vmatpush1.bf16.msra.mxu0 %v3372_v38  ;;  %v63_v38 = vld [vmem:[%s4333_s1 + $0x168] sm:$0xff] }
  0x31   :  { %v3400_v40 = vpack.c.bf16 %v63_v38, %v62_v37  ;;  %v2922_v38 = vld [vmem:[%s4335_s3 + $0x80] ss:$8 sm:$0x3] }
  0x33   :  { %219 = vmatmul.mubr.f32.vlgmr.msra.gmra.mrb[0].mxu0 %v144_v12  ;;  %v3381_v12 = vpack.c.bf16 %v83_v10, %v82_v9  ;;  %3401 = vmatprep.subr.bf16.mxu0 %v3400_v40  ;;  %v73_v9 = vld [vmem:[%s4333_s1 + $0x1b8] sm:$0xff] }
 0x106   :  { %v220_v47 = vpop.f32.mrb[0].mxu0 }
 0x107   :  { %v3776_v48 = vadd.f32 %v2923_v46, %v220_v47  ;;  %v222_v49 = vpop.f32.mrb[1].mxu0  ;;  %v65_v46 = vld [vmem:[%s4333_s1 + $0x178] sm:$0xff]  ;;  %v3402_v47 = vpack.c.bf16 %v47_v42, %v46_v39 }
 0x108   :  { %v3404_v49 = vpack.c.bf16 %v65_v46, %v64_v43 }
 0x109   :  { %v225_v50 = vsel %vm224_vm2, %v3776_v48, 0.0  ;;  %3403 = vmatpush3.bf16.msra.mxu0 %v3402_v47 }
 0x10a   :  { %v226_v51 = vrot.slane %v225_v50, 4  ;;  %3405 = vmatprep.subr.bf16.mxu0 %v3404_v49 }
 0x10c   :  { %v227_v52 = vadd.f32 %v226_v51, %v225_v50  ;;  %v48_v50 = vld [vmem:[%s4333_s1 + $0xf0] sm:$0xff]  ;;  %v49_v51 = vld [vmem:[%s4333_s1 + $0xf8] sm:$0xff] }
 0x10e   :  { %v228_v53 = vrot.slane %v227_v52, 2 }
 0x110   :  { %v229_v54 = vadd.f32 %v228_v53, %v227_v52  ;;  %v66_v52 = vld [vmem:[%s4333_s1 + $0x180] sm:$0xff]  ;;  %v67_v53 = vld [vmem:[%s4333_s1 + $0x188] sm:$0xff] }
 0x112   :  { %v230_v55 = vrot.slane %v229_v54, 1 }
 0x114   :  { %v231_v56 = vadd.f32 %v230_v55, %v229_v54  ;;  %v3406_v54 = vpack.c.bf16 %v49_v51, %v48_v50  ;;  %v3408_v55 = vpack.c.bf16 %v67_v53, %v66_v52 }
 0x116   :  { %v233_v57 = vmul.f32 0.25, %v231_v56  ;;  %v50_v56 = vld [vmem:[%s4333_s1 + $0x100] sm:$0xff]  ;;  %3407 = vmatpush3.bf16.msra.mxu0 %v3406_v54 }
 0x117   :  { %3409 = vmatprep.subr.bf16.mxu0 %v3408_v55 }
 0x118   :  { %3135 = vmatmul.mubr.msk.f32.vlgmr.msra.gmra.mrb[0].mxu1 %vm234_vm3, %v233_v57  ;;  %v51_v57 = vld [vmem:[%s4333_s1 + $0x108] sm:$0xff] }
 0x119   :  { %3139 = vmatprep.mubr.msk.f32.mxu1 %vm3605_vm1, %v3606_v45  ;;  %3138 = vmatpush3.xpose.msk.msra.mxu1 %vm234_vm3, %v125_v58 }
 0x11a   :  { %3142 = vmatprep.subr.mxu1 %v3606_v45 }
 0x1eb   :  { %v304_v60 = vpop.f32.mrb[0].mxu1 }
 0x1ec   :  { %v3791_v61 = vadd.f32 %v304_v60, %v115_v59  ;;  %v3136_v62 = vpop.f32.mrb[1].mxu1  ;;  %v69_v59 = vld [vmem:[%s4333_s1 + $0x198] sm:$0xff]  ;;  %v3410_v60 = vpack.c.bf16 %v51_v57, %v50_v56 }
 0x1ee   :  { %3140 = vmatmul.mubr.msk.f32.vlgmr.msra.gmra.mrb[2].mxu1 %vm234_vm3, %v3791_v61  ;;  %3411 = vmatpush3.bf16.msra.mxu0 %v3410_v60 }
 0x1ef   :  { %3144 = vmatprep.mubr.msk.f32.mxu1 %vm3605_vm1, %v3606_v45  ;;  %3143 = vmatpush3.msk.msra.mxu1 %vm400_vm5, %v125_v58  ;;  %v68_v58 = vld [vmem:[%s4333_s1 + $0x190] sm:$0xff] }
 0x1f0   :  { %3380 = vmatprep.subr.bf16.mxu1 %v3604_v3  ;;  %v3412_v62 = vpack.c.bf16 %v69_v59, %v68_v58  ;;  %v135_v59 = vld [vmem:[%s4335_s3 + $0x48] sm:$0xff] }
 0x1f2   :  { %3413 = vmatprep.subr.bf16.mxu0 %v3412_v62  ;;  %v134_v62 = vld [vmem:[%s4335_s3 + $0x40] sm:$0xff] }
 0x2c1   :  { %v380_v63 = vpop.f32.mrb[2].mxu1 }
 0x2c2   :  { %v3141_v0 = vpop.f32.mrb[3].mxu1  ;;  %v385_v1 = vsel %vm384_vm4, %v380_v63, -inf }
 0x2c3   :  { %386 = vmax.xlane.f32.xlu0 %v385_v1  ;;  %v53_v0 = vld [vmem:[%s4333_s1 + $0x118] sm:$0xff]  ;;  %v70_v1 = vld [vmem:[%s4333_s1 + $0x1a0] sm:$0xff] }
 0x350   :  { %v387_v2 = vpop.xlane.xlu0 %386 }
 0x351   :  { %v388_v4 = vsub.f32 %v380_v63, %v387_v2  ;;  %v52_v63 = vld [vmem:[%s4333_s1 + $0x110] sm:$0xff]  ;;  %v71_v2 = vld [vmem:[%s4333_s1 + $0x1a8] sm:$0xff] }
 0x353   :  { %v389_v5 = vmul.f32 1.442695, %v388_v4  ;;  %v3414_v4 = vpack.c.bf16 %v53_v0, %v52_v63  ;;  %v136_v63 = vld [vmem:[%s4335_s3 + $0x50] sm:$0xff] }
 0x354   :  { %v3440_v0 = vpack.c.bf16 %v136_v63, %v134_v62 }
 0x355   :  { %3531 = vpow2.f32 %v389_v5  ;;  %v3416_v5 = vpack.c.bf16 %v71_v2, %v70_v1  ;;  %3415 = vmatpush3.bf16.msra.mxu0 %v3414_v4  ;;  %v139_v1 = vld [vmem:[%s4335_s3 + $0x68] sm:$0xff]  ;;  %v141_v2 = vld [vmem:[%s4335_s3 + $0x78] sm:$0xff] }
 0x356   :  { %v3442_v4 = vpack.c.bf16 %v141_v2, %v139_v1 }
 0x357   :  { %3417 = vmatprep.subr.bf16.mxu0 %v3416_v5  ;;  %v138_v5 = vld [vmem:[%s4335_s3 + $0x60] sm:$0xff] }
 0x35f   :  { %v3532_v6 = vpop.eup %3531 }
 0x360   :  { %v391_v7 = vsel %vm384_vm4, %v3532_v6, 0.0  ;;  %vm2603_vm4 = vcmask 35840  }
 0x361   :  { %392 = vadd.xlane.f32.xlu0 %v391_v7  ;;  %v55_v7 = vld [vmem:[%s4333_s1 + $0x128] sm:$0xff] }
 0x3ee   :  { %v393_v8 = vpop.xlane.xlu0 %392 }
 0x3ef   :  { %3533 = vrcp.f32 %v393_v8  ;;  %v72_v8 = vld [vmem:[%s4333_s1 + $0x1b0] sm:$0xff] }
 0x3f9   :  { %v3534_v11 = vpop.eup %3533 }
 0x3fa   :  { %v395_v13 = vmul.f32 %v3534_v11, %v3532_v6  ;;  %v54_v6 = vld [vmem:[%s4333_s1 + $0x120] sm:$0xff]  ;;  %v3420_v11 = vpack.c.bf16 %v73_v9, %v72_v8 }
 0x3fb   :  { %v3418_v10 = vpack.c.bf16 %v55_v7, %v54_v6  ;;  %v140_v6 = vld [vmem:[%s4335_s3 + $0x70] sm:$0xff] }
 0x3fc   :  { %3145 = vmatmul.mubr.msk.f32.vlgmr.msra.gmra.mrb[4].mxu1 %vm396_vm6, %v395_v13  ;;  %v57_v13 = vld [vmem:[%s4333_s1 + $0x138] sm:$0xff]  ;;  %v3444_v7 = vpack.c.bf16 %v140_v6, %v138_v5 }
 0x3fd   :  { %3382 = vmatpush3.bf16.msra.mxu1 %v3381_v12  ;;  %3155 = vmatprep.mubr.msk.f32.mxu1 %vm3605_vm1, %v3606_v45  ;;  %v56_v12 = vld [vmem:[%s4333_s1 + $0x130] sm:$0xff] }
 0x3fe   :  { %3383 = vmatprep.subr.bf16.mxu1 %v3604_v3  ;;  %3419 = vmatpush3.bf16.msra.mxu0 %v3418_v10 }
 0x3ff   :  { %3421 = vmatprep.subr.bf16.mxu0 %v3420_v11 }
 0x401   :  { %3385 = vmatpush3.bf16.msra.mxu1 %v3384_v16  ;;  %v3422_v16 = vpack.c.bf16 %v57_v13, %v56_v12 }
 0x402   :  { %3386 = vmatprep.subr.bf16.mxu1 %v3604_v3 }
 0x403   :  { %3423 = vmatpush3.bf16.msra.mxu0 %v3422_v16  ;;  %v2935_v16 = vld [vmem:[%s4334_s2 + $0x4] ss:$0 sm:$0xff] }
 0x404   :  { %3425 = vmatprep.subr.bf16.mxu0 %v3424_v17 }
 0x4cf   :  { %v469_v22 = vpop.f32.mrb[4].mxu1 }
 0x4d0   :  { %v3146_v23 = vpop.f32.mrb[5].mxu1  ;;  %3156 = vmatmul.mubr.msk.f32.vlgmr.msra.gmra.mrb[6].mxu1 %vm234_vm3, %v469_v22 }
 0x4d1   :  { %3388 = vmatpush3.bf16.msra.mxu1 %v3387_v19  ;;  %3166 = vmatprep.mubr.msk.f32.mxu1 %vm3605_vm1, %v3606_v45  ;;  %v59_v19 = vld [vmem:[%s4333_s1 + $0x148] sm:$0xff]  ;;  %v116_v23 = vld [vmem:[%s4334_s2 + $0x2] sm:$0x1] }
 0x4d2   :  { %3389 = vmatprep.subr.bf16.mxu1 %v3604_v3  ;;  %v3426_v20 = vpack.c.bf16 %v59_v19, %v58_v18 }
 0x4d4   :  { %3427 = vmatpush3.bf16.msra.mxu0 %v3426_v20 }
 0x4d5   :  { %3391 = vmatpush3.bf16.msra.mxu1 %v3390_v24 }
 0x4d6   :  { %3393 = vmatprep.subr.bf16.mxu1 %v3392_v27 }
 0x4d8   :  { %3167 = vmatmul.mubr.msk.f32.vlgmr.msra.gmra.mrb[8].mxu1 %vm234_vm3, %v3791_v61 }
 0x4d9   :  { %696 = vmatprep.mubr.f32.mxu1 %v3606_v45  ;;  %3395 = vmatpush1.bf16.msra.mxu1 %v3394_v30  ;;  %v77_v30 = vld [vmem:[%s4333_s1 + $0x1d8] sm:$0xff] }
 0x4da   :  { %3397 = vmatprep.subr.bf16.mxu1 %v3396_v33  ;;  %v3428_v31 = vpack.c.bf16 %v77_v30, %v76_v29  ;;  %v61_v33 = vld [vmem:[%s4333_s1 + $0x158] sm:$0xff] }
 0x4db   :  { %v3430_v34 = vpack.c.bf16 %v61_v33, %v60_v32 }
 0x4dc   :  { %3429 = vmatprep.subr.bf16.mxu0 %v3428_v31 }
 0x4dd   :  { %3399 = vmatpush1.bf16.msra.mxu1 %v3398_v36  ;;  %3431 = vmatpush3.bf16.msra.mxu0 %v3430_v34  ;;  %v620_v36 = vshrl.u32 %v619_v35, 7 }
 0x4de   :  { %3180 = vmatprep.subr.mxu1 %v3606_v45  ;;  %3432 = vmatprep.subr.bf16.mxu0 %v3604_v3 }
 0x4df   :  { %v625_v37 = vsub.s32 1, %v620_v36  ;;  %v621_v39 = vsub.s32 0, %v620_v36 }
 0x4e1   :  { %v626_v40 = vrot.slane %v2922_v38, %v625_v37  ;;  %v622_v42 = vrot.slane %v2922_v38, %v621_v39 }
 0x5a3   :  { %v542_v21 = vpop.f32.mrb[6].mxu1 }
 0x5a4   :  { %v3157_v22 = vpop.f32.mrb[7].mxu1 }
 0x5ab   :  { %v612_v24 = vpop.f32.mrb[8].mxu1 }
 0x5ac   :  { %v613_v25 = vadd.f32 %v612_v24, %v542_v21  ;;  %v3168_v26 = vpop.f32.mrb[9].mxu1 }
 0x5ae   :  { %v616_v27 = vadd.f32 %v613_v25, %v116_v23 }
 0x5b0   :  { %v617_v28 = vmax.f32 %v616_v27, 0.0 }
 0x5b2   :  { %2932 = vmatmul.mubr.msk.f32.vlgmr.msra.gmra.mrb[10].mxu1 %vm234_vm3, %v617_v28 }
 0x5b3   :  { %3182 = vmatprep.mubr.msk.f32.mxu1 %vm3605_vm1, %v3606_v45 }
 0x685   :  { %v698_v43 = vpop.f32.mrb[10].mxu1 }
 0x686   :  { %v700_v46 = vpop.f32.mrb[11].mxu1  ;;  %v699_v49 = vadd.f32 %v698_v43, %v622_v42 }
 0x687   :  { %v701_v47 = vadd.f32 %v700_v46, %v626_v40 }
 0x689   :  { %767 = vmatprep.mubr.f32.mxu0 %v701_v47 }
 0x68a   :  { %768 = vmatmul.mubr.f32.vlgmr.msra.gmra.mrb[2].mxu0 %v699_v49 }
 0x68b   :  { %3434 = vmatpush3.bf16.msra.mxu0 %v3757_v41  ;;  %3177 = vmatprep.mubr.msk.f32.mxu0 %vm3605_vm1, %v3606_v45 }
 0x68c   :  { %3435 = vmatprep.subr.bf16.mxu0 %v3604_v3 }
 0x68f   :  { %3437 = vmatpush3.bf16.msra.mxu0 %v3767_v44 }
 0x75d   :  { %v3050_v50 = vpop.f32.mrb[2].mxu0 }
 0x75e   :  { %v3051_v51 = vpop.f32.mrb[3].mxu0 }
 0x75f   :  { %v3052_v52 = vadd.f32 %v3051_v51, %v3050_v50 }
 0x761   :  { %v850_v53 = vrot.slane %v3052_v52, %v621_v39  ;;  %3178 = vmatmul.mubr.msk.f32.vlgmr.msra.gmra.mrb[4].mxu0 %vm234_vm3, %v3052_v52 }
 0x762   :  { %943 = vmatprep.mubr.f32.mxu0 %v3606_v45 }
 0x763   :  { %v3974_v54 = vadd.f32 %v850_v53, %v3776_v48  ;;  %v137_v48 = vld [vmem:[%s4335_s3 + $0x58] sm:$0xff] }
 0x764   :  { %v3438_v60 = vpack.c.bf16 %v137_v48, %v135_v59 }
 0x765   :  { %v852_v41 = vsel %vm224_vm2, %v3974_v54, 0.0 }
 0x766   :  { %853 = vadd.xlane.f32.xlu1 %v852_v41  ;;  %3439 = vmatprep.subr.bf16.mxu0 %v3438_v60 }
 0x767   :  { %3441 = vmatpush1.bf16.msra.mxu0 %v3440_v0 }
 0x768   :  { %3443 = vmatprep.subr.bf16.mxu0 %v3442_v4 }
 0x76b   :  { %3445 = vmatpush1.bf16.msra.mxu0 %v3444_v7 }
 0x76c   :  { %3185 = vmatprep.subr.mxu0 %v3606_v45 }
 0x7f3   :  { %v854_v55 = vpop.xlane.xlu1 %853 }
 0x7f4   :  { %v856_v56 = vmul.f32 0.03125, %v854_v55 }
 0x7f6   :  { %v857_v57 = vsub.f32 %v3974_v54, %v856_v56 }
 0x7f8   :  { %v858_v44 = vmul.f32 %v857_v57, %v857_v57 }
 0x7fa   :  { %v859_v58 = vsel %vm224_vm2, %v858_v44, 0.0 }
 0x7fb   :  { %860 = vadd.xlane.f32.xlu1 %v859_v58 }
 0x834   :  { %v4005_v8 = vpop.f32.mrb[4].mxu0 }
 0x835   :  { %v3179_v9 = vpop.f32.mrb[5].mxu0 }
 0x888   :  { %v861_v10 = vpop.xlane.xlu1 %860 }
 0x889   :  { %v862_v11 = vmul.f32 0.03125, %v861_v10 }
 0x88b   :  { %v863_v12 = vadd.f32 1e-05, %v862_v11 }
 0x88d   :  { %3535 = vrsqrt.f32 %v863_v12 }
 0x897   :  { %v3536_v13 = vpop.eup %3535 }
 0x898   :  { %v865_v15 = vmul.f32 %v3536_v13, %v857_v57 }
 0x89a   :  { %v870_v17 = vmul.f32 %v2934_v14, %v865_v15 }
 0x89c   :  { %v875_v18 = vadd.f32 %v2935_v16, %v870_v17 }
 0x89e   :  { %2936 = vmatmul.mubr.msk.f32.vlgmr.msra.gmra.mrb[6].mxu0 %vm234_vm3, %v875_v18 }
 0x89f   :  { %3187 = vmatprep.mubr.msk.f32.mxu0 %vm3605_vm1, %v3606_v45 }
 0x971   :  { %v4016_v19 = vpop.f32.mrb[6].mxu0 }
 0x972   :  { %950 = vrot.lane.b32.xlu0 %v4016_v19, %s3607_s10  ;;  %v947_v20 = vpop.f32.mrb[7].mxu0  ;;  %s3631_s10 = smov 8  }
 0x976   :  { %1120 = vrot.lane.b32.xlu0 %v4016_v19, %s3608_s0  ;;  %s3632_s0 = smov 12  }
 0x97a   :  { %1287 = vrot.lane.b32.xlu0 %v4016_v19, %s3609_s11  ;;  %s3633_s11 = smov 16  }
 0x97e   :  { %1454 = vrot.lane.b32.xlu0 %v4016_v19, %s3610_s12  ;;  %s3634_s12 = smov 20  }
 0x982   :  { %1621 = vrot.lane.b32.xlu0 %v4016_v19, %s3611_s13 }
 0x986   :  { %1788 = vrot.lane.b32.xlu0 %v4016_v19, %s3612_s14 }
 0x98a   :  { %1955 = vrot.lane.b32.xlu0 %v4016_v19, %s3613_s15 }
 0x98e   :  { %2122 = vrot.lane.b32.xlu0 %v4016_v19, %s3614_s16 }
 0x9e4   :  { %v951_v21 = vpop.permute.xlu0 %950 }
 0x9e5   :  { %3181 = vmatpush3.xpose.msk.msra.mxu1 %vm952_vm7, %v951_v21 }
 0x9e6   :  { %3195 = vmatprep.subr.mxu1 %v3606_v45 }
 0x9e8   :  { %3183 = vmatmul.mubr.msk.f32.vlgmr.msra.gmra.mrb[12].mxu1 %vm952_vm7, %v4016_v19  ;;  %v1121_v34 = vpop.permute.xlu0 %1120 }
 0x9e9   :  { %3197 = vmatprep.mubr.msk.f32.mxu1 %vm3605_vm1, %v3606_v45 }
 0x9ec   :  { %v1288_v35 = vpop.permute.xlu0 %1287 }
 0x9f0   :  { %v1455_v39 = vpop.permute.xlu0 %1454 }
 0x9f4   :  { %v1622_v42 = vpop.permute.xlu0 %1621 }
 0x9f8   :  { %v1789_v46 = vpop.permute.xlu0 %1788 }
 0x9fc   :  { %v1956_v49 = vpop.permute.xlu0 %1955 }
 0xa00   :  { %v2123_v51 = vpop.permute.xlu0 %2122 }
 0xabb   :  { %v1023_v22 = vpop.f32.mrb[12].mxu1 }
 0xabc   :  { %v1027_v23 = vmul.f32 0.5, %v1023_v22  ;;  %v3184_v24 = vpop.f32.mrb[13].mxu1 }
 0xabe   :  { %v1029_v25 = vsel %vm1028_vm8, %v1027_v23, -inf }
 0xabf   :  { %1030 = vmax.xlane.f32.xlu1 %v1029_v25 }
 0xad0   :  { %1040 = vrot.lane.b32.xlu1 %v4016_v19, %s3615_s17  ;;  %s3635_s17 = smov 24  }
 0xad4   :  { %1118 = vrot.lane.b32.xlu1 %v4016_v19, %s3616_s18  ;;  %s3636_s18 = smov 28  }
 0xb4c   :  { %v1031_v26 = vpop.xlane.xlu1 %1030 }
 0xb4d   :  { %v1032_v27 = vsub.f32 %v1027_v23, %v1031_v26 }
 0xb4f   :  { %v1033_v28 = vmul.f32 1.442695, %v1032_v27 }
 0xb50   :  { %v1041_v29 = vpop.permute.xlu1 %1040 }
 0xb51   :  { %3537 = vpow2.f32 %v1033_v28  ;;  %3186 = vmatpush3.msk.msra.mxu0 %vm1045_vm9, %v1041_v29 }
 0xb52   :  { %3190 = vmatprep.subr.mxu0 %v3606_v45 }
 0xb54   :  { %v1119_v32 = vpop.permute.xlu1 %1118 }
 0xb5b   :  { %v3538_v30 = vpop.eup %3537 }
 0xb5c   :  { %v1035_v31 = vsel %vm1028_vm8, %v3538_v30, 0.0 }
 0xb5d   :  { %1036 = vadd.xlane.f32.xlu1 %v1035_v31 }
 0xb6e   :  { %1285 = vrot.lane.b32.xlu1 %v4016_v19, %s3617_s19 }
 0xb72   :  { %1452 = vrot.lane.b32.xlu1 %v4016_v19, %s3618_s20 }
 0xb76   :  { %1619 = vrot.lane.b32.xlu1 %v4016_v19, %s3619_s21 }
 0xb7a   :  { %1786 = vrot.lane.b32.xlu1 %v4016_v19, %s3620_s22 }
 0xb7e   :  { %1953 = vrot.lane.b32.xlu1 %v4016_v19, %s3621_s23 }
 0xb82   :  { %2120 = vrot.lane.b32.xlu1 %v4016_v19, %s3622_s24  ;;  %s3637_s24 = smov [#allocation2]  }
 0xbea   :  { %v1037_v33 = vpop.xlane.xlu1 %1036 }
 0xbeb   :  { %3539 = vrcp.f32 %v1037_v33 }
 0xbee   :  { %v1286_v37 = vpop.permute.xlu1 %1285 }
 0xbf2   :  { %v1453_v40 = vpop.permute.xlu1 %1452 }
 0xbf5   :  { %v3540_v36 = vpop.eup %3539 }
 0xbf6   :  { %v1039_v38 = vmul.f32 %v3540_v36, %v3538_v30  ;;  %v1620_v43 = vpop.permute.xlu1 %1619 }
 0xbf8   :  { %3188 = vmatmul.mubr.msk.f32.vlgmr.msra.gmra.mrb[8].mxu0 %vm952_vm7, %v1039_v38 }
 0xbf9   :  { %3191 = vmatpush3.xpose.msk.msra.mxu0 %vm952_vm7, %v1121_v34  ;;  %3192 = vmatprep.mubr.msk.f32.mxu0 %vm3605_vm1, %v3606_v45 }
 0xbfa   :  { %3200 = vmatprep.subr.mxu0 %v3606_v45  ;;  %v1787_v47 = vpop.permute.xlu1 %1786 }
 0xbfc   :  { %3193 = vmatmul.mubr.msk.f32.vlgmr.msra.gmra.mrb[10].mxu0 %vm952_vm7, %v1119_v32 }
 0xbfd   :  { %3201 = vmatpush3.xpose.msk.msra.mxu0 %vm952_vm7, %v1288_v35  ;;  %3202 = vmatprep.mubr.msk.f32.mxu0 %vm3605_vm1, %v3606_v45 }
 0xbfe   :  { %3210 = vmatprep.subr.mxu0 %v3606_v45  ;;  %v1954_v50 = vpop.permute.xlu1 %1953 }
 0xc00   :  { %3203 = vmatmul.mubr.msk.f32.vlgmr.msra.gmra.mrb[12].mxu0 %vm952_vm7, %v1286_v37 }
 0xc01   :  { %3211 = vmatpush3.xpose.msk.msra.mxu0 %vm952_vm7, %v1455_v39  ;;  %3212 = vmatprep.mubr.msk.f32.mxu0 %vm3605_vm1, %v3606_v45 }
 0xc02   :  { %3220 = vmatprep.subr.mxu0 %v3606_v45  ;;  %v2121_v52 = vpop.permute.xlu1 %2120 }
 0xc04   :  { %3213 = vmatmul.mubr.msk.f32.vlgmr.msra.gmra.mrb[14].mxu0 %vm952_vm7, %v1453_v40 }
 0xc05   :  { %3221 = vmatpush3.xpose.msk.msra.mxu0 %vm952_vm7, %v1622_v42  ;;  %3222 = vmatprep.mubr.msk.f32.mxu0 %vm3605_vm1, %v3606_v45 }
 0xc06   :  { %3230 = vmatprep.subr.mxu0 %v3606_v45 }
 0xc08   :  { %3223 = vmatmul.mubr.msk.f32.vlgmr.msra.gmra.mrb[16].mxu0 %vm952_vm7, %v1620_v43 }
 0xc09   :  { %3231 = vmatpush3.xpose.msk.msra.mxu0 %vm952_vm7, %v1789_v46  ;;  %3232 = vmatprep.mubr.msk.f32.mxu0 %vm3605_vm1, %v3606_v45 }
 0xc0a   :  { %3240 = vmatprep.subr.mxu0 %v3606_v45 }
 0xc0c   :  { %3233 = vmatmul.mubr.msk.f32.vlgmr.msra.gmra.mrb[18].mxu0 %vm952_vm7, %v1787_v47 }
 0xc0d   :  { %3241 = vmatpush3.xpose.msk.msra.mxu0 %vm952_vm7, %v1956_v49  ;;  %3242 = vmatprep.mubr.msk.f32.mxu0 %vm3605_vm1, %v3606_v45 }
 0xc0e   :  { %3250 = vmatprep.subr.mxu0 %v3606_v45 }
 0xc10   :  { %3243 = vmatmul.mubr.msk.f32.vlgmr.msra.gmra.mrb[20].mxu0 %vm952_vm7, %v1954_v50 }
 0xc11   :  { %3251 = vmatpush3.xpose.msk.msra.mxu0 %vm952_vm7, %v2123_v51  ;;  %3252 = vmatprep.mubr.msk.f32.mxu0 %vm3605_vm1, %v3606_v45 }
 0xc12   :  { %3446 = vmatprep.subr.bf16.mxu0 %v3604_v3 }
 0xc14   :  { %3253 = vmatmul.mubr.msk.f32.vlgmr.msra.gmra.mrb[22].mxu0 %vm952_vm7, %v2121_v52 }
 0xc15   :  { %3268 = vmatprep.mubr.msk.f32.mxu0 %vm3605_vm1, %v3606_v45 }
 0xccb   :  { %v4082_v53 = vpop.f32.mrb[8].mxu0 }
 0xccc   :  { %v3189_v41 = vpop.f32.mrb[9].mxu0 }
 0xccf   :  { %v1192_v55 = vpop.f32.mrb[10].mxu0 }
 0xcd0   :  { %v1196_v56 = vmul.f32 0.5, %v1192_v55  ;;  %v3194_v57 = vpop.f32.mrb[11].mxu0 }
 0xcd2   :  { %v1197_v44 = vsel %vm1028_vm8, %v1196_v56, -inf }
 0xcd3   :  { %1198 = vmax.xlane.f32.xlu0 %v1197_v44  ;;  %v1359_v58 = vpop.f32.mrb[12].mxu0 }
 0xcd4   :  { %v1363_v59 = vmul.f32 0.5, %v1359_v58  ;;  %v3204_v48 = vpop.f32.mrb[13].mxu0 }
 0xcd6   :  { %v1364_v60 = vsel %vm1028_vm8, %v1363_v59, -inf }
 0xcd7   :  { %1365 = vmax.xlane.f32.xlu1 %v1364_v60  ;;  %v1526_v62 = vpop.f32.mrb[14].mxu0 }
 0xcd8   :  { %v1530_v63 = vmul.f32 0.5, %v1526_v62  ;;  %v3214_v0 = vpop.f32.mrb[15].mxu0 }
 0xcda   :  { %v1531_v1 = vsel %vm1028_vm8, %v1530_v63, -inf }
 0xcdb   :  { %1532 = vmax.xlane.f32.xlu0 %v1531_v1  ;;  %v1693_v2 = vpop.f32.mrb[16].mxu0 }
 0xcdc   :  { %v1697_v4 = vmul.f32 0.5, %v1693_v2  ;;  %v3224_v5 = vpop.f32.mrb[17].mxu0 }
 0xcde   :  { %v1698_v6 = vsel %vm1028_vm8, %v1697_v4, -inf }
 0xcdf   :  { %1699 = vmax.xlane.f32.xlu0 %v1698_v6  ;;  %v1860_v7 = vpop.f32.mrb[18].mxu0 }
 0xce0   :  { %v1864_v9 = vmul.f32 0.5, %v1860_v7  ;;  %v3234_v10 = vpop.f32.mrb[19].mxu0 }
 0xce2   :  { %v1865_v11 = vsel %vm1028_vm8, %v1864_v9, -inf }
 0xce3   :  { %1866 = vmax.xlane.f32.xlu0 %v1865_v11  ;;  %v2027_v12 = vpop.f32.mrb[20].mxu0 }
 0xce4   :  { %v4089_v13 = vmul.f32 0.5, %v2027_v12  ;;  %v3244_v14 = vpop.f32.mrb[21].mxu0 }
 0xce6   :  { %v2032_v15 = vsel %vm1028_vm8, %v4089_v13, -inf }
 0xce7   :  { %2033 = vmax.xlane.f32.xlu1 %v2032_v15  ;;  %v2194_v16 = vpop.f32.mrb[22].mxu0 }
 0xce8   :  { %v2198_v17 = vmul.f32 0.5, %v2194_v16  ;;  %v3254_v18 = vpop.f32.mrb[23].mxu0 }
 0xcea   :  { %v2199_v20 = vsel %vm1028_vm8, %v2198_v17, -inf }
 0xceb   :  { %2200 = vmax.xlane.f32.xlu0 %v2199_v20 }
 0xcf8   :  { %1375 = vrot.lane.b32.xlu1 %v4016_v19, %s3623_s25  ;;  %s2914_s25 = sshll.u32 %s3637_s24, 4  ;;  %s2915_s25 = int_to_ptr.vmem [resolvable:$true] %s2914_s25 }
 0xcf9   :  { %p3585_p1 = scmp.lt.s32.totalorder %s2915_s25, %s2915_s25 }
 0xcfc   :  { %1542 = vrot.lane.b32.xlu1 %v4016_v19, %s3624_s26  ;;  %s3580_s26 = scalar_lea.vmem %s2915_s25, 16 }
 0xcfd   :  { %p3581_p0 = scmp.ne.s32.totalorder %s2915_s25, %s3580_s26 }
 0xd00   :  { %1709 = vrot.lane.b32.xlu1 %v4016_v19, %s3625_s27 }
 0xd01   :  { %1208 = vrot.lane.b32.xlu0 %v4016_v19, %s3626_s28 }
 0xd60   :  { %v1199_v21 = vpop.xlane.xlu0 %1198 }
 0xd61   :  { %v1200_v22 = vsub.f32 %v1196_v56, %v1199_v21 }
 0xd63   :  { %v1201_v23 = vmul.f32 1.442695, %v1200_v22 }
 0xd64   :  { %v1366_v24 = vpop.xlane.xlu1 %1365 }
 0xd65   :  { %3541 = vpow2.f32 %v1201_v23  ;;  %v1367_v25 = vsub.f32 %v1363_v59, %v1366_v24 }
 0xd67   :  { %v1368_v26 = vmul.f32 1.442695, %v1367_v25 }
 0xd68   :  { %v1533_v27 = vpop.xlane.xlu0 %1532 }
 0xd69   :  { %3543 = vpow2.f32 %v1368_v26  ;;  %v1534_v28 = vsub.f32 %v1530_v63, %v1533_v27 }
 0xd6b   :  { %v1535_v29 = vmul.f32 1.442695, %v1534_v28 }
 0xd6c   :  { %v1700_v30 = vpop.xlane.xlu0 %1699 }
 0xd6d   :  { %3545 = vpow2.f32 %v1535_v29  ;;  %v1701_v31 = vsub.f32 %v1697_v4, %v1700_v30  ;;  %v86_v29 = vld [vmem:[%s4333_s1 + $0x220] sm:$0xff]  ;;  %v87_v30 = vld [vmem:[%s4333_s1 + $0x228] sm:$0xff] }
 0xd6f   :  { %v3542_v32 = vpop.eup %3541  ;;  %v1702_v33 = vmul.f32 1.442695, %v1701_v31 }
 0xd70   :  { %v1867_v34 = vpop.xlane.xlu0 %1866  ;;  %v1203_v35 = vsel %vm1028_vm8, %v3542_v32, 0.0 }
 0xd71   :  { %3547 = vpow2.f32 %v1702_v33  ;;  %v1868_v36 = vsub.f32 %v1864_v9, %v1867_v34  ;;  %1204 = vadd.xlane.f32.xlu1 %v1203_v35 }
 0xd73   :  { %v3544_v37 = vpop.eup %3543  ;;  %v1869_v38 = vmul.f32 1.442695, %v1868_v36 }
 0xd74   :  { %v1370_v39 = vsel %vm1028_vm8, %v3544_v37, 0.0  ;;  %v2034_v57 = vpop.xlane.xlu1 %2033 }
 0xd75   :  { %3549 = vpow2.f32 %v1869_v38  ;;  %1371 = vadd.xlane.f32.xlu0 %v1370_v39  ;;  %v2035_v44 = vsub.f32 %v4089_v13, %v2034_v57  ;;  %v88_v39 = vld [vmem:[%s4333_s1 + $0x230] sm:$0xff] }
 0xd77   :  { %v3546_v40 = vpop.eup %3545  ;;  %v2036_v58 = vmul.f32 1.442695, %v2035_v44 }
 0xd78   :  { %v2201_v42 = vpop.xlane.xlu0 %2200  ;;  %v1537_v43 = vsel %vm1028_vm8, %v3546_v40, 0.0  ;;  %v1376_v60 = vpop.permute.xlu1 %1375 }
 0xd79   :  { %v2202_v46 = vsub.f32 %v2198_v17, %v2201_v42  ;;  %1538 = vadd.xlane.f32.xlu1 %v1537_v43 }
 0xd7b   :  { %v3548_v47 = vpop.eup %3547  ;;  %v2203_v49 = vmul.f32 1.442695, %v2202_v46 }
 0xd7c   :  { %v1209_v50 = vpop.permute.xlu0 %1208  ;;  %v1704_v51 = vsel %vm1028_vm8, %v3548_v47, 0.0  ;;  %v1543_v62 = vpop.permute.xlu1 %1542 }
 0xd7d   :  { %3551 = vpow2.f32 %v2203_v49  ;;  %1705 = vadd.xlane.f32.xlu0 %v1704_v51  ;;  %3196 = vmatpush3.msk.msra.mxu1 %vm1045_vm9, %v1209_v50 }
 0xd7e   :  { %3205 = vmatprep.subr.mxu1 %v3606_v45  ;;  %3553 = vpow2.f32 %v2036_v58 }
 0xd7f   :  { %v3550_v52 = vpop.eup %3549 }
 0xd80   :  { %v1871_v41 = vsel %vm1028_vm8, %v3550_v52, 0.0  ;;  %v1710_v63 = vpop.permute.xlu1 %1709 }
 0xd81   :  { %1872 = vadd.xlane.f32.xlu1 %v1871_v41 }
 0xd87   :  { %v4105_v55 = vpop.eup %3551 }
 0xd88   :  { %v2205_v56 = vsel %vm1028_vm8, %v4105_v55, 0.0  ;;  %v3554_v59 = vpop.eup %3553 }
 0xd89   :  { %2206 = vadd.xlane.f32.xlu1 %v2205_v56  ;;  %v2038_v48 = vsel %vm1028_vm8, %v3554_v59, 0.0 }
 0xd93   :  { %1876 = vrot.lane.b32.xlu0 %v4016_v19, %s3627_s29 }
 0xd9a   :  { %2043 = vrot.lane.b32.xlu1 %v4016_v19, %s3628_s30 }
 0xdb2   :  { %2039 = vadd.xlane.f32.xlu0 %v2038_v48 }
 0xdc8   :  { %2210 = vrot.lane.b32.xlu0 %v4016_v19, %s3629_s5 }
 0xdfe   :  { %v1205_v0 = vpop.xlane.xlu1 %1204 }
 0xdff   :  { %3555 = vrcp.f32 %v1205_v0 }
 0xe02   :  { %v1372_v1 = vpop.xlane.xlu0 %1371 }
 0xe03   :  { %3557 = vrcp.f32 %v1372_v1 }
 0xe06   :  { %v1539_v2 = vpop.xlane.xlu1 %1538 }
 0xe07   :  { %3559 = vrcp.f32 %v1539_v2 }
 0xe09   :  { %v3556_v4 = vpop.eup %3555 }
 0xe0a   :  { %v1207_v5 = vmul.f32 %v3556_v4, %v3542_v32  ;;  %v1706_v6 = vpop.xlane.xlu0 %1705  ;;  %v3447_v32 = vpack.c.bf16 %v87_v30, %v86_v29 }
 0xe0b   :  { %3561 = vrcp.f32 %v1706_v6  ;;  %v3579_v6 = vld [vmem:[%s4334_s2 + $0xb] sm:$0x1f] }
 0xe0c   :  { %3198 = vmatmul.mubr.msk.f32.vlgmr.msra.gmra.mrb[14].mxu1 %vm952_vm7, %v1207_v5  ;;  %3448 = vmatpush3.bf16.msra.mxu0 %v3447_v32 }
 0xe0d   :  { %v3558_v7 = vpop.eup %3557  ;;  %3206 = vmatpush3.msk.msra.mxu1 %vm1045_vm9, %v1376_v60  ;;  %3207 = vmatprep.mubr.msk.f32.mxu1 %vm3605_vm1, %v3606_v45 }
 0xe0e   :  { %v1374_v19 = vmul.f32 %v3558_v7, %v3544_v37  ;;  %v1873_v9 = vpop.xlane.xlu1 %1872  ;;  %3215 = vmatprep.subr.mxu1 %v3606_v45  ;;  %v1877_v15 = vpop.permute.xlu0 %1876  ;;  %3449 = vmatprep.subr.bf16.mxu0 %v3604_v3  ;;  %v2430_v7 = vsel %vm2429_vm0, %v3579_v6, 0.0 }
 0xe0f   :  { %3563 = vrcp.f32 %v1873_v9 }
 0xe10   :  { %3208 = vmatmul.mubr.msk.f32.vlgmr.msra.gmra.mrb[16].mxu1 %vm952_vm7, %v1374_v19 }
 0xe11   :  { %v3560_v10 = vpop.eup %3559  ;;  %3216 = vmatpush3.msk.msra.mxu1 %vm1045_vm9, %v1543_v62  ;;  %3217 = vmatprep.mubr.msk.f32.mxu1 %vm3605_vm1, %v3606_v45 }
 0xe12   :  { %v1541_v11 = vmul.f32 %v3560_v10, %v3546_v40  ;;  %3225 = vmatprep.subr.mxu1 %v3606_v45  ;;  %v89_v40 = vld [vmem:[%s4333_s1 + $0x238] sm:$0xff] }
 0xe13   :  { %v3450_v42 = vpack.c.bf16 %v89_v40, %v88_v39  ;;  %v2974_v39 = vld [vmem:[%s4334_s2 + $0x8] ss:$0 sm:$0xff] }
 0xe14   :  { %3218 = vmatmul.mubr.msk.f32.vlgmr.msra.gmra.mrb[18].mxu1 %vm952_vm7, %v1541_v11 }
 0xe15   :  { %v3562_v12 = vpop.eup %3561  ;;  %3226 = vmatpush3.msk.msra.mxu1 %vm1045_vm9, %v1710_v63  ;;  %3227 = vmatprep.mubr.msk.f32.mxu1 %vm3605_vm1, %v3606_v45 }
 0xe16   :  { %v1708_v13 = vmul.f32 %v3562_v12, %v3548_v47  ;;  %v2207_v14 = vpop.xlane.xlu1 %2206  ;;  %3235 = vmatprep.subr.mxu1 %v3606_v45  ;;  %3451 = vmatpush3.bf16.msra.mxu0 %v3450_v42 }
 0xe17   :  { %3282 = vmatprep.subr.mxu0 %v3606_v45 }
 0xe18   :  { %3228 = vmatmul.mubr.msk.f32.vlgmr.msra.gmra.mrb[20].mxu1 %vm952_vm7, %v1708_v13 }
 0xe19   :  { %v3564_v16 = vpop.eup %3563  ;;  %3236 = vmatpush3.msk.msra.mxu1 %vm1045_vm9, %v1877_v15  ;;  %3237 = vmatprep.mubr.msk.f32.mxu1 %vm3605_vm1, %v3606_v45 }
 0xe1a   :  { %v1875_v17 = vmul.f32 %v3564_v16, %v3550_v52  ;;  %v2044_v18 = vpop.permute.xlu1 %2043  ;;  %3245 = vmatprep.subr.mxu1 %v3606_v45 }
 0xe1c   :  { %3238 = vmatmul.mubr.msk.f32.vlgmr.msra.gmra.mrb[22].mxu1 %vm952_vm7, %v1875_v17  ;;  %v90_v17 = vld [vmem:[%s4333_s1 + $0x240] sm:$0xff] }
 0xe1d   :  { %3246 = vmatpush3.msk.msra.mxu1 %vm1045_vm9, %v2044_v18  ;;  %3247 = vmatprep.mubr.msk.f32.mxu1 %vm3605_vm1, %v3606_v45  ;;  %v91_v18 = vld [vmem:[%s4333_s1 + $0x248] sm:$0xff] }
 0xe1e   :  { %3255 = vmatprep.subr.mxu1 %v3606_v45 }
 0xe3f   :  { %v2040_v20 = vpop.xlane.xlu0 %2039 }
 0xe40   :  { %3565 = vrcp.f32 %v2040_v20  ;;  %v3453_v20 = vpack.c.bf16 %v91_v18, %v90_v17  ;;  %v107_v17 = vld [vmem:[%s4333_s1 + $0x2c8] sm:$0xff] }
 0xe41   :  { %3567 = vrcp.f32 %v2207_v14 }
 0xe43   :  { %v2211_v24 = vpop.permute.xlu0 %2210 }
 0xe4a   :  { %v3566_v21 = vpop.eup %3565 }
 0xe4b   :  { %v2042_v22 = vmul.f32 %v3566_v21, %v3554_v59  ;;  %v3568_v23 = vpop.eup %3567  ;;  %v92_v21 = vld [vmem:[%s4333_s1 + $0x250] sm:$0xff] }
 0xe4c   :  { %v2209_v25 = vmul.f32 %v3568_v23, %v4105_v55 }
 0xe4d   :  { %3248 = vmatmul.mubr.msk.f32.vlgmr.msra.gmra.mrb[24].mxu1 %vm952_vm7, %v2042_v22  ;;  %v93_v22 = vld [vmem:[%s4333_s1 + $0x258] sm:$0xff] }
 0xe4e   :  { %3256 = vmatpush3.msk.msra.mxu1 %vm1045_vm9, %v2211_v24  ;;  %3257 = vmatprep.mubr.msk.f32.mxu1 %vm3605_vm1, %v3606_v45  ;;  %v3456_v23 = vpack.c.bf16 %v93_v22, %v92_v21  ;;  %v109_v21 = vld [vmem:[%s4333_s1 + $0x2d8] sm:$0xff] }
 0xe4f   :  { %3452 = vmatprep.subr.bf16.mxu1 %v3604_v3 }
 0xe51   :  { %3258 = vmatmul.mubr.msk.f32.vlgmr.msra.gmra.mrb[26].mxu1 %vm952_vm7, %v2209_v25 }
 0xe52   :  { %3279 = vmatprep.mubr.msk.f32.mxu1 %vm3605_vm1, %v3606_v45  ;;  %3454 = vmatpush3.bf16.msra.mxu1 %v3453_v20  ;;  %v108_v20 = vld [vmem:[%s4333_s1 + $0x2d0] sm:$0xff] }
 0xe53   :  { %3455 = vmatprep.subr.bf16.mxu1 %v3604_v3  ;;  %v3485_v22 = vpack.c.bf16 %v109_v21, %v108_v20 }
 0xe56   :  { %3457 = vmatpush3.bf16.msra.mxu1 %v3456_v23  ;;  %v2980_v23 = vld [vmem:[%s4334_s2 + $0xa] ss:$0 sm:$0xff] }
 0xe57   :  { %3287 = vmatprep.subr.mxu1 %v3606_v45 }
 0xedf   :  { %v1281_v26 = vpop.f32.mrb[14].mxu1 }
 0xee0   :  { %2288 = vrot.lane.b32.xlu1 %v1281_v26, %s3630_s6  ;;  %v3199_v27 = vpop.f32.mrb[15].mxu1 }
 0xee3   :  { %v1448_v28 = vpop.f32.mrb[16].mxu1 }
 0xee4   :  { %2292 = vrot.lane.b32.xlu0 %v1448_v28, %s3631_s10  ;;  %v3209_v31 = vpop.f32.mrb[17].mxu1 }
 0xee5   :  { %v2971_v31 = vld [vmem:[%s4334_s2 + $0x5] ss:$0 sm:$0xff] }
 0xee7   :  { %v1615_v33 = vpop.f32.mrb[18].mxu1 }
 0xee8   :  { %2296 = vrot.lane.b32.xlu1 %v1615_v33, %s3632_s0  ;;  %v3219_v34 = vpop.f32.mrb[19].mxu1  ;;  %v2972_v33 = vld [vmem:[%s4334_s2 + $0x6] ss:$0 sm:$0xff] }
 0xeeb   :  { %v1782_v35 = vpop.f32.mrb[20].mxu1 }
 0xeec   :  { %2300 = vrot.lane.b32.xlu0 %v1782_v35, %s3633_s11  ;;  %v3229_v36 = vpop.f32.mrb[21].mxu1 }
 0xeed   :  { %v2973_v36 = vld [vmem:[%s4334_s2 + $0x7] ss:$0 sm:$0xff] }
 0xeef   :  { %v1949_v37 = vpop.f32.mrb[22].mxu1 }
 0xef0   :  { %2304 = vrot.lane.b32.xlu1 %v1949_v37, %s3634_s12  ;;  %v3239_v38 = vpop.f32.mrb[23].mxu1 }
 0xf20   :  { %v2116_v43 = vpop.f32.mrb[24].mxu1 }
 0xf21   :  { %2308 = vrot.lane.b32.xlu0 %v2116_v43, %s3635_s17  ;;  %v3249_v46 = vpop.f32.mrb[25].mxu1 }
 0xf24   :  { %v2283_v47 = vpop.f32.mrb[26].mxu1 }
 0xf25   :  { %2312 = vrot.lane.b32.xlu1 %v2283_v47, %s3636_s18  ;;  %v3259_v49 = vpop.f32.mrb[27].mxu1 }
 0xf52   :  { %v2289_v50 = vpop.permute.xlu1 %2288 }
 0xf53   :  { %v2315_v55 = vsel %vm952_vm7, %v4082_v53, %v2289_v50  ;;  %v2969_v53 = vld [vmem:[%s4334_s2 + $0x9] ss:$0 sm:$0xff] }
 0xf56   :  { %v2293_v51 = vpop.permute.xlu0 %2292 }
 0xf57   :  { %v2317_v56 = vsel %vm2316_vm10, %v2315_v55, %v2293_v51 }
 0xf5a   :  { %v2297_v52 = vpop.permute.xlu1 %2296 }
 0xf5b   :  { %v2319_v44 = vsel %vm2318_vm11, %v2317_v56, %v2297_v52 }
 0xf5e   :  { %v2301_v41 = vpop.permute.xlu0 %2300 }
 0xf5f   :  { %v2321_v59 = vsel %vm2320_vm12, %v2319_v44, %v2301_v41  ;;  %v94_v44 = vld [vmem:[%s4333_s1 + $0x260] sm:$0xff] }
 0xf62   :  { %v2305_v57 = vpop.permute.xlu1 %2304 }
 0xf63   :  { %v2323_v48 = vsel %vm2322_vm13, %v2321_v59, %v2305_v57  ;;  %v96_v59 = vld [vmem:[%s4333_s1 + $0x270] sm:$0xff] }
 0xf93   :  { %v2309_v58 = vpop.permute.xlu0 %2308 }
 0xf94   :  { %v2325_v60 = vsel %vm2324_vm14, %v2323_v48, %v2309_v58  ;;  %v95_v58 = vld [vmem:[%s4333_s1 + $0x268] sm:$0xff] }
 0xf95   :  { %v3459_v48 = vpack.c.bf16 %v95_v58, %v94_v44 }
 0xf97   :  { %v2313_v62 = vpop.permute.xlu1 %2312 }
 0xf98   :  { %v2327_v63 = vsel %vm2326_vm15, %v2325_v60, %v2313_v62  ;;  %v97_v60 = vld [vmem:[%s4333_s1 + $0x278] sm:$0xff] }
 0xf99   :  { %3269 = vmatmul.mubr.msk.f32.vlgmr.msra.gmra.mrb[24].mxu0 %vm234_vm3, %v2327_v63  ;;  %v3462_v62 = vpack.c.bf16 %v97_v60, %v96_v59 }
 0xf9a   :  { %3284 = vmatprep.mubr.msk.f32.mxu0 %vm3605_vm1, %v3606_v45 }
0x106c   :  { %v2401_v0 = vpop.f32.mrb[24].mxu0 }
0x106d   :  { %v2402_v1 = vadd.f32 %v2969_v53, %v2401_v0  ;;  %v3270_v2 = vpop.f32.mrb[25].mxu0 }
0x106f   :  { %v4171_v4 = vadd.f32 %v2402_v1, %v3974_v54 }
0x1071   :  { %v2406_v5 = vsel %vm224_vm2, %v4171_v4, 0.0 }
0x1072   :  { %2407 = vadd.xlane.f32.xlu0 %v2406_v5  ;;  %v98_v5 = vld [vmem:[%s4333_s1 + $0x280] sm:$0xff] }
0x1076   :  { %2431 = vadd.xlane.f32.xlu0 %v2430_v7 }
0x10ff   :  { %v2408_v19 = vpop.xlane.xlu0 %2407 }
0x1100   :  { %v2409_v9 = vmul.f32 0.03125, %v2408_v19 }
0x1102   :  { %v2410_v10 = vsub.f32 %v4171_v4, %v2409_v9  ;;  %v101_v9 = vld [vmem:[%s4333_s1 + $0x298] sm:$0xff] }
0x1103   :  { %v2432_v11 = vpop.xlane.xlu0 %2431 }
0x1104   :  { %v2411_v12 = vmul.f32 %v2410_v10, %v2410_v10  ;;  %v2433_v54 = vmul.f32 0.03125, %v2432_v11  ;;  %v102_v11 = vld [vmem:[%s4333_s1 + $0x2a0] sm:$0xff] }
0x1106   :  { %v2412_v13 = vsel %vm224_vm2, %v2411_v12, 0.0  ;;  %v2434_v14 = vsub.f32 %v3579_v6, %v2433_v54  ;;  %v99_v6 = vld [vmem:[%s4333_s1 + $0x288] sm:$0xff] }
0x1107   :  { %2413 = vadd.xlane.f32.xlu1 %v2412_v13  ;;  %v3465_v19 = vpack.c.bf16 %v99_v6, %v98_v5  ;;  %v103_v12 = vld [vmem:[%s4333_s1 + $0x2a8] sm:$0xff]  ;;  %v104_v13 = vld [vmem:[%s4333_s1 + $0x2b0] sm:$0xff] }
0x1108   :  { %v2435_v15 = vmul.f32 %v2434_v14, %v2434_v14  ;;  %v3473_v54 = vpack.c.bf16 %v103_v12, %v102_v11 }
0x110a   :  { %v2436_v16 = vsel %vm2429_vm0, %v2435_v15, 0.0 }
0x110b   :  { %2437 = vadd.xlane.f32.xlu0 %v2436_v16  ;;  %v106_v16 = vld [vmem:[%s4333_s1 + $0x2c0] sm:$0xff] }
0x110c   :  { %v3481_v18 = vpack.c.bf16 %v107_v17, %v106_v16 }
0x1194   :  { %v2414_v24 = vpop.xlane.xlu1 %2413 }
0x1195   :  { %v2415_v25 = vmul.f32 0.03125, %v2414_v24 }
0x1197   :  { %v2416_v26 = vadd.f32 1e-05, %v2415_v25 }
0x1198   :  { %v2438_v27 = vpop.xlane.xlu0 %2437 }
0x1199   :  { %3569 = vrsqrt.f32 %v2416_v26  ;;  %v2439_v28 = vmul.f32 0.03125, %v2438_v27 }
0x119b   :  { %v2440_v29 = vadd.f32 1e-05, %v2439_v28 }
0x119d   :  { %3571 = vrsqrt.f32 %v2440_v29 }
0x11a3   :  { %v3570_v30 = vpop.eup %3569 }
0x11a4   :  { %v2418_v32 = vmul.f32 %v3570_v30, %v2410_v10 }
0x11a6   :  { %v2423_v34 = vmul.f32 %v2971_v31, %v2418_v32 }
0x11a7   :  { %v3572_v35 = vpop.eup %3571 }
0x11a8   :  { %v2428_v37 = vadd.f32 %v2972_v33, %v2423_v34  ;;  %v2442_v38 = vmul.f32 %v3572_v35, %v2434_v14  ;;  %v105_v14 = vld [vmem:[%s4333_s1 + $0x2b8] sm:$0xff] }
0x11a9   :  { %v3477_v15 = vpack.c.bf16 %v105_v14, %v104_v13 }
0x11aa   :  { %3280 = vmatmul.mubr.msk.f32.vlgmr.msra.gmra.mrb[28].mxu1 %vm234_vm3, %v2428_v37  ;;  %v2447_v40 = vmul.f32 %v2973_v36, %v2442_v38  ;;  %v846_v36 = vadd.f32 %v4005_v8, %v3791_v61  ;;  %v112_v61 = vld [vmem:[%s4333_s1 + $0x2f0] sm:$0xff]  ;;  %v113_v8 = vld [vmem:[%s4333_s1 + $0x2f8] sm:$0xff] }
0x11ab   :  { %3289 = vmatprep.mubr.msk.f32.mxu1 %vm3605_vm1, %v3606_v45 }
0x11ac   :  { %v2452_v42 = vadd.f32 %v2974_v39, %v2447_v40 }
0x11ae   :  { %3283 = vmatpush3.xpose.msk.msra.mxu0 %vm234_vm3, %v2452_v42  ;;  %3288 = vmatpush3.msk.msra.mxu1 %vm400_vm5, %v2452_v42  ;;  %vm4243_vm5 = vmpackc.low %vm234_vm3, %vm234_vm3  ;;  %v111_v42 = vld [vmem:[%s4333_s1 + $0x2e8] sm:$0xff] }
0x11af   :  { %3458 = vmatprep.subr.bf16.mxu0 %v3604_v3  ;;  %3464 = vmatprep.subr.bf16.mxu1 %v3604_v3 }
0x127d   :  { %v2522_v43 = vpop.f32.mrb[28].mxu1 }
0x127e   :  { %v3281_v46 = vpop.f32.mrb[29].mxu1  ;;  %3285 = vmatmul.mubr.msk.f32.vlgmr.msra.gmra.mrb[26].mxu0 %vm234_vm3, %v2522_v43 }
0x127f   :  { %3300 = vmatprep.mubr.msk.f32.mxu0 %vm3605_vm1, %v3606_v45  ;;  %3460 = vmatpush3.bf16.msra.mxu0 %v3459_v48  ;;  %v3493_v46 = vpack.c.bf16 %v113_v8, %v112_v61 }
0x1280   :  { %3461 = vmatprep.subr.bf16.mxu0 %v3604_v3 }
0x1283   :  { %3463 = vmatpush3.bf16.msra.mxu0 %v3462_v62 }
0x1351   :  { %v2598_v47 = vpop.f32.mrb[26].mxu0 }
0x1352   :  { %v2602_v49 = vmul.f32 0.5, %v2598_v47  ;;  %v3286_v50 = vpop.f32.mrb[27].mxu0 }
0x1354   :  { %v2604_v51 = vsel %vm2603_vm4, %v2602_v49, -inf }
0x1355   :  { %2605 = vmax.xlane.f32.xlu0 %v2604_v51 }
0x13e2   :  { %v2606_v52 = vpop.xlane.xlu0 %2605 }
0x13e3   :  { %v2607_v41 = vsub.f32 %v2602_v49, %v2606_v52 }
0x13e5   :  { %v2608_v55 = vmul.f32 1.442695, %v2607_v41 }
0x13e7   :  { %3573 = vpow2.f32 %v2608_v55 }
0x13f1   :  { %v3574_v56 = vpop.eup %3573 }
0x13f2   :  { %v2610_v57 = vsel %vm2603_vm4, %v3574_v56, 0.0 }
0x13f3   :  { %2611 = vadd.xlane.f32.xlu1 %v2610_v57 }
0x1480   :  { %v2612_v63 = vpop.xlane.xlu1 %2611 }
0x1481   :  { %3575 = vrcp.f32 %v2612_v63 }
0x148b   :  { %v3576_v53 = vpop.eup %3575 }
0x148c   :  { %v2614_v0 = vmul.f32 %v3576_v53, %v3574_v56 }
0x148e   :  { %3290 = vmatmul.mubr.msk.f32.vlgmr.msra.gmra.mrb[30].mxu1 %vm396_vm6, %v2614_v0 }
0x148f   :  { %3335 = vmatprep.mubr.msk.f32.mxu1 %vm3605_vm1, %v3606_v45  ;;  %3467 = vmatpush3.bf16.xpose.msk.msra.mxu1 %vm4243_vm5, %v3465_v19  ;;  %v100_v45 = vld [vmem:[%s4333_s1 + $0x290] sm:$0xff]  ;;  %vm2779_vm1 = vcmask 253952  }
0x1490   :  { %3468 = vmatprep.subr.bf16.mxu1 %v3604_v3  ;;  %v3469_v10 = vpack.c.bf16 %v101_v9, %v100_v45 }
0x1497   :  { %3471 = vmatpush3.bf16.xpose.msk.msra.mxu1 %vm4243_vm5, %v3469_v10 }
0x1498   :  { %3472 = vmatprep.subr.bf16.mxu1 %v3604_v3 }
0x149f   :  { %3475 = vmatpush3.bf16.xpose.msk.msra.mxu1 %vm4243_vm5, %v3473_v54 }
0x14a0   :  { %3476 = vmatprep.subr.bf16.mxu1 %v3604_v3 }
0x14a7   :  { %3479 = vmatpush3.bf16.xpose.msk.msra.mxu1 %vm4243_vm5, %v3477_v15 }
0x14a8   :  { %3480 = vmatprep.subr.bf16.mxu1 %v3604_v3 }
0x14af   :  { %3483 = vmatpush3.bf16.xpose.msk.msra.mxu1 %vm4243_vm5, %v3481_v18 }
0x14b0   :  { %3484 = vmatprep.subr.bf16.mxu1 %v3604_v3 }
0x14b7   :  { %3487 = vmatpush3.bf16.xpose.msk.msra.mxu1 %vm4243_vm5, %v3485_v22 }
0x14b8   :  { %3488 = vmatprep.subr.bf16.mxu1 %v3604_v3 }
0x1561   :  { %v2686_v1 = vpop.f32.mrb[30].mxu1 }
0x1562   :  { %v3291_v2 = vpop.f32.mrb[31].mxu1  ;;  %3301 = vmatmul.mubr.msk.f32.vlgmr.msra.gmra.mrb[28].mxu0 %vm234_vm3, %v2686_v1 }
0x1635   :  { %v2763_v24 = vpop.f32.mrb[28].mxu0 }
0x1636   :  { %v2764_v25 = vadd.f32 %v2980_v23, %v2763_v24  ;;  %v3302_v26 = vpop.f32.mrb[29].mxu0 }
0x1638   :  { %v2767_v27 = vadd.f32 %v2764_v25, %v4171_v4  ;;  %v110_v4 = vld [vmem:[%s4333_s1 + $0x2e0] sm:$0xff]  ;;  %s3584_s1 = scalar_lea.vmem %s2915_s25, 32 }
0x1639   :  { %v3489_v43 = vpack.c.bf16 %v111_v42, %v110_v4  ;;  %p3586_p2 = scmp.lt.s32.totalorder %s3584_s1, %s3580_s26 }
0x163a   :  { %v2768_v28 = vsel %vm224_vm2, %v2767_v27, 0.0 }
0x163b   :  { %v2769_v29 = vrot.slane %v2768_v28, 4  ;;  %3491 = vmatpush3.bf16.xpose.msk.msra.mxu1 %vm4243_vm5, %v3489_v43  ;;  %p3587_p3 = por %p3586_p2, %p3585_p1 }
0x163c   :  { %3492 = vmatprep.subr.bf16.mxu1 %v3604_v3 }
0x163d   :  { %v2770_v30 = vadd.f32 %v2769_v29, %v2768_v28  ;;  %p3588_p4 = pnand %p3587_p3, %p3581_p0 }
0x163f   :  { %v2771_v31 = vrot.slane %v2770_v30, 2 }
0x1641   :  { %v2772_v32 = vadd.f32 %v2771_v31, %v2770_v30 }
0x1643   :  { %v2773_v33 = vrot.slane %v2772_v32, 1  ;;  %3495 = vmatpush3.bf16.xpose.msk.msra.mxu1 %vm4243_vm5, %v3493_v46 }
0x1645   :  { %v2774_v34 = vadd.f32 %v2773_v33, %v2772_v32 }
0x1647   :  { %v2775_v35 = vmul.f32 0.25, %v2774_v34 }
0x1649   :  { %v2776_v37 = vmul.f32 0.5, %v2775_v35 }
0x164b   :  { %v2777_v38 = vadd.f32 %v2776_v37, %v846_v36 }
0x164d   :  { %v2778_v39 = vmul.f32 %v2777_v38, %v2777_v38 }
0x164f   :  { %v2780_v40 = vsel %vm2779_vm1, %v2778_v39, 0.0 }
0x1650   :  { %2781 = vadd.xlane.f32.xlu0 %v2780_v40 }
0x16dd   :  { %v2782_v47 = vpop.xlane.xlu0 %2781 }
0x16de   :  { %v2783_v49 = vadd.f32 1e-12, %v2782_v47 }
0x16e0   :  { %3577 = vrsqrt.f32 %v2783_v49 }
0x16ea   :  { %v3578_v50 = vpop.eup %3577 }
0x16eb   :  { %v2785_v51 = vmul.f32 %v3578_v50, %v2777_v38 }
0x16ed   :  { %3336 = vmatmul.mubr.msk.f32.vlgmr.msra.gmra.mrb[32].mxu1 %vm234_vm3, %v2785_v51 }
0x17c0   :  { %v2903_v3 = vpop.f32.mrb[32].mxu1 }
0x17c1   :  { %2907 = vst [vmem:[#allocation2] sm:$0x1] %v2903_v3  ;;  %v3337_v52 = vpop.f32.mrb[33].mxu1 }
0x17c2   :  { %3591 = shalt.err (!%p3588_p4)
}
0x17c3   :  { %s3592_s29 = scalar_lea.hbm %s4336_s4, 16 }
0x17c4   :  { %p3593_p5 = scmp.ne.s32.totalorder %s4336_s4, %s3592_s29  ;;  %p3596_p6 = scmp.lt.u32.totalorder %s3592_s29, %s4336_s4 }
0x17c6   :  { %p3598_p7 = pnand %p3596_p6, %p3593_p5 }
0x17c8   :  { %3601 = shalt.err (!%p3598_p7)
}
0x17c9   :  { %2917 = dma.vmem_to_hbm [thread:$0]  %s2915_s25, 16, %s4336_s4, [#allocation3]  }
0x17ca   :  { %3602 = dma.done.wait [#allocation3], 16  }
0x17cb   :  { %3603 = vsyncadd [#allocation3], 4294967280 }
0x17cc   :  { %2921 = vsyncpa [#allocation3], 1 }

</bundles_post_ra>
